<compile_context>
chip_gen: v6e
topology: v6e:2x2x1
jax: 0.10.0
libtpu: 0.0.40
codegen_flags: <defaults>
</compile_context>

<pallas_src>
import functools

import jax
import jax.numpy as jnp
from jax.experimental import pallas as pl
from jax.experimental.pallas import tpu as pltpu

K_HOPS = 2   # DGL TAGConv default k=2
LANE = 128   # TPU lane width


def _round_up(x, m):
    return ((x + m - 1) // m) * m


@functools.lru_cache(maxsize=None)
def _vmem_limit_bytes():
    """Generation-aware scoped-VMEM limit (~7/8 of physical), with a safe fallback."""
    default = 48 * 1024 * 1024          # safe on v7x (64 MiB physical) and below
    try:
        info = pltpu.get_tpu_info()
    except Exception:
        return default
    cap = getattr(info, "vmem_capacity_bytes", None) or getattr(info, "vmem_bytes", None)
    if not cap:
        return default
    return int(min(cap * 7 // 8, cap - 8 * 1024 * 1024))


def _choose_tile(n, fp, vmem_budget):
    """Largest 128-multiple row tile whose pass-2 working set fits the VMEM budget."""
    n_lane = _round_up(max(n, 128), 128)
    for tm in (1024, 512, 256, 128):
        if tm > n_lane:
            continue
        npad = _round_up(max(n, tm), tm)
        need = (
            2 * tm * npad * 2          # double-buffered A row tiles (bf16)
            + 2 * npad * fp * 2        # resident H1 (bf16), counted double-buffered
            + 2 * tm * fp * 2          # H row tile (bf16)
            + 2 * 3 * fp * fp * 2      # stacked projection weights (bf16)
            + 2 * tm * fp * 4          # f32 output tile
            + (2 << 20)                # slack for compiler scratch
        )
        if need <= vmem_budget:
            return tm, npad
    tm = 128
    return tm, _round_up(max(n, tm), tm)


# ----------------------------- Pallas kernels ------------------------------ #
def _hop_kernel(a_ref, h_ref, o_ref):
    """One propagation hop for a row tile: o = A_row_tile @ H (bf16 in, f32 acc)."""
    o_ref[...] = jnp.dot(
        a_ref[...], h_ref[...], preferred_element_type=jnp.float32
    ).astype(o_ref.dtype)


def _hop_project_kernel(a_ref, h_ref, h1_ref, w_ref, b_ref, o_ref, *, tm, apply_relu):
    """Second hop + fused per-hop projection for one row tile.

    a_ref : (tm, NP)    bf16  A row tile (streamed)
    h_ref : (tm, FP)    bf16  hop-0 features (row tile)
    h1_ref: (NP, FP)    bf16  hop-1 features (full, resident across the grid)
    w_ref : (3*FP, FP)  bf16  stacked per-hop projection weights
    b_ref : (1, FP)     f32   bias
    o_ref : (tm, FP)          layer output row tile
    """
    # Hop 2 for this row tile (needs the full H1).
    h2 = jnp.dot(
        a_ref[...], h1_ref[...], preferred_element_type=jnp.float32
    ).astype(jnp.bfloat16)
    # Local H1 rows for the projection term.
    row0 = pl.multiple_of(pl.program_id(0) * tm, tm)
    h1_tile = h1_ref[pl.ds(row0, tm), :]
    # Fused projection: single K = 3*FP matmul (concat is lane-aligned, contiguous).
    hcat = jnp.concatenate([h_ref[...], h1_tile, h2], axis=-1)
    out = jnp.dot(hcat, w_ref[...], preferred_element_type=jnp.float32) + b_ref[...]
    if apply_relu:
        out = jnp.maximum(out, 0.0)
    o_ref[...] = out.astype(o_ref.dtype)


# ------------------------------ layer wrapper ------------------------------ #
def _tagconv_layer(a_pad, h, w_cat, b_row, *, tm, apply_relu, out_dtype):
    npad, fp = h.shape
    grid = (npad // tm,)
    cparams = pltpu.CompilerParams(
        dimension_semantics=("parallel",), vmem_limit_bytes=_vmem_limit_bytes()
    )

    # Pass 1: H1 = A @ H  (A streamed in (tm, NP) tiles; H resident across the grid).
    h1 = pl.pallas_call(
        _hop_kernel,
        out_shape=jax.ShapeDtypeStruct((npad, fp), jnp.bfloat16),
        grid_spec=pltpu.PrefetchScalarGridSpec(
            num_scalar_prefetch=0,
            grid=grid,
            in_specs=[
                pl.BlockSpec((tm, npad), lambda i: (i, 0)),    # A row tile
                pl.BlockSpec((npad, fp), lambda i: (0, 0)),    # H (resident)
            ],
            out_specs=pl.BlockSpec((tm, fp), lambda i: (i, 0)),
        ),
        compiler_params=cparams,
        cost_estimate=pl.CostEstimate(
            flops=2 * npad * npad * fp,
            transcendentals=0,
            bytes_accessed=2 * npad * npad + 4 * npad * fp,
        ),
    )(a_pad, h)

    # Pass 2: H2 = A @ H1 per row tile + fused projection [H|H1|H2] @ Wcat + b (+ReLU).
    kern = functools.partial(_hop_project_kernel, tm=tm, apply_relu=apply_relu)
    out = pl.pallas_call(
        kern,
        out_shape=jax.ShapeDtypeStruct((npad, fp), out_dtype),
        grid_spec=pltpu.PrefetchScalarGridSpec(
            num_scalar_prefetch=0,
            grid=grid,
            in_specs=[
                pl.BlockSpec((tm, npad), lambda i: (i, 0)),      # A row tile
                pl.BlockSpec((tm, fp), lambda i: (i, 0)),        # H row tile (hop-0)
                pl.BlockSpec((npad, fp), lambda i: (0, 0)),      # H1 (resident)
                pl.BlockSpec((3 * fp, fp), lambda i: (0, 0)),    # stacked Wcat
                pl.BlockSpec((1, fp), lambda i: (0, 0)),         # bias
            ],
            out_specs=pl.BlockSpec((tm, fp), lambda i: (i, 0)),
        ),
        compiler_params=cparams,
        cost_estimate=pl.CostEstimate(
            flops=2 * npad * npad * fp + 2 * npad * 3 * fp * fp,
            transcendentals=0,
            bytes_accessed=2 * npad * npad + 8 * npad * fp + 6 * fp * fp,
        ),
    )(a_pad, h, h1, w_cat, b_row)
    return out


@functools.partial(jax.jit, static_argnames=("tm",))
def tagcn_forward(a_pad, h0, w_list, b_list, *, tm):
    """Padded TAGCN forward (eval mode); returns padded f32 logits [NP, FP]."""
    # TODO(synk): nn.Dropout is training-only; this is the eval-mode forward (identity).
    h = h0
    n_layers = len(w_list)
    for li in range(n_layers):
        last = li == n_layers - 1
        h = _tagconv_layer(
            a_pad, h, w_list[li], b_list[li],
            tm=tm,
            apply_relu=not last,
            out_dtype=jnp.float32 if last else jnp.bfloat16,
        )
    return h


# ------------------------- one-time prep (hoisted) ------------------------- #
def prepare_graph(a_hat, npad):
    """Cast A_hat to bf16 and zero-pad to [NP, NP] once, outside the per-call path."""
    n = a_hat.shape[0]
    a = jnp.zeros((npad, npad), jnp.bfloat16)
    return a.at[:n, :n].set(a_hat.astype(jnp.bfloat16))


def prepare_features(features, npad, fp):
    n, f = features.shape
    h = jnp.zeros((npad, fp), jnp.bfloat16)
    return h.at[:n, :f].set(features.astype(jnp.bfloat16))


def init_tagcn_params(key, in_feats, n_hidden, n_classes, n_layers):
    """Deterministic Glorot-ish init. Linear weight stored as [(K+1)*in, out]."""
    dims = [(in_feats, n_hidden)]
    dims += [(n_hidden, n_hidden)] * (n_layers - 1)
    dims += [(n_hidden, n_classes)]
    params = []
    for fi, fo in dims:
        key, wk = jax.random.split(key)
        fan_in = (K_HOPS + 1) * fi
        w = jax.random.normal(wk, (fan_in, fo), jnp.float32) / jnp.sqrt(
            jnp.float32(fan_in)
        )
        b = jnp.zeros((fo,), jnp.float32)
        params.append((w, b))
    return params


def _pack_params(params, fp):
    """Per layer: stack the per-hop W blocks into one zero-padded [3*FP, FP] bf16 Wcat.

    Padded rows AND columns (and padded bias lanes) are zero, so padded feature lanes
    stay exactly 0 through every layer's projection and ReLU.
    """
    ws, bs = [], []
    for w, b in params:
        f_in = w.shape[0] // (K_HOPS + 1)
        f_out = w.shape[1]
        w_cat = jnp.zeros(((K_HOPS + 1) * fp, fp), jnp.float32)
        for k in range(K_HOPS + 1):
            blk = w[k * f_in:(k + 1) * f_in, :]
            w_cat = w_cat.at[k * fp:k * fp + f_in, :f_out].set(blk)
        b_row = jnp.zeros((1, fp), jnp.float32).at[0, :f_out].set(b)
        ws.append(w_cat.astype(jnp.bfloat16))
        bs.append(b_row)
    return ws, bs


def tagcn_reference(a_hat, features, params):
    """Pure-JAX f32 reference of the same forward pass (sanity check)."""
    h = features
    for i, (w, b) in enumerate(params):
        h1 = a_hat @ h
        h2 = a_hat @ h1
        z = jnp.concatenate([h, h1, h2], axis=-1)
        h = z @ w + b
        if i != len(params) - 1:
            h = jnp.maximum(h, 0.0)
    return h


# --------------------------------- main ------------------------------------ #
if __name__ == "__main__":
    key = jax.random.PRNGKey(0)

    # Small synthetic graph / feature sizes.
    N = 128          # number of nodes
    IN_FEATS = 16
    N_HIDDEN = 32
    N_CLASSES = 8
    N_LAYERS = 2     # -> 3 TAGConv layers total (in->hid, hid->hid, hid->classes)

    key, k_adj, k_feat, k_par = jax.random.split(key, 4)

    # Random symmetric adjacency (no self loops needed: hop-0 term covers identity).
    a_rand = jax.random.bernoulli(k_adj, p=0.08, shape=(N, N)).astype(jnp.float32)
    a = jnp.maximum(a_rand, a_rand.T)
    deg = jnp.maximum(a.sum(axis=1), 1.0)
    norm = deg ** -0.5
    a_hat = (norm[:, None] * a) * norm[None, :]  # D^-1/2 A D^-1/2

    features = jax.random.normal(k_feat, (N, IN_FEATS), jnp.float32)
    params = init_tagcn_params(k_par, IN_FEATS, N_HIDDEN, N_CLASSES, N_LAYERS)

    # Plan padded sizes / tile size from shapes + generation-aware VMEM budget.
    feat_dims = [IN_FEATS] + [w.shape[1] for (w, _) in params]
    FP = _round_up(max(feat_dims + [LANE]), LANE)
    TM, NP = _choose_tile(N, FP, _vmem_limit_bytes())

    # One-time prep (hoisted out of the per-call path).
    a_pad = prepare_graph(a_hat, NP)
    h0 = prepare_features(features, NP, FP)
    ws, bs = _pack_params(params, FP)

    out_padded = tagcn_forward(a_pad, h0, tuple(ws), tuple(bs), tm=TM)
    out_padded = jax.block_until_ready(out_padded)
    out = out_padded[:N, :N_CLASSES]

    assert out.shape == (N, N_CLASSES)
    assert jnp.all(jnp.isfinite(out))

    # Check vs f32 reference (kernel runs bf16 MXU inputs / f32 accumulation).
    ref = tagcn_reference(a_hat, features, params)
    rel_err = jnp.max(jnp.abs(out - ref)) / (jnp.max(jnp.abs(ref)) + 1e-6)
    assert rel_err < 5e-2, f"relative error too large: {rel_err}"

    print("KERNEL_OK")
</pallas_src>

<mosaic_0001>
module attributes {stable_mosaic.version = 11 : i64} {
  func.func @_hop_project_kernel(%arg0: i32, %arg1: memref<128x128xbf16, #tpu.memory_space<vmem>>, %arg2: memref<128x128xbf16, #tpu.memory_space<vmem>>, %arg3: memref<128x128xbf16, #tpu.memory_space<vmem>>, %arg4: memref<384x128xbf16, #tpu.memory_space<vmem>>, %arg5: memref<1x128xf32, #tpu.memory_space<vmem>>, %arg6: memref<128x128xbf16, #tpu.memory_space<vmem>>) attributes {dimension_semantics = [#tpu.dimension_semantics<parallel>], iteration_bounds = array<i64: 1>, scalar_prefetch = 0 : i64, scratch_operands = 0 : i64, tpu.core_type = #tpu.core_type<tc>, window_params = [{transform_indices = @transform_0, window_bounds = array<i64: 128, 128>}, {transform_indices = @transform_1, window_bounds = array<i64: 128, 128>}, {pipeline_mode = #tpu.pipeline_mode<synchronous>, transform_indices = @transform_2, window_bounds = array<i64: 128, 128>}, {pipeline_mode = #tpu.pipeline_mode<synchronous>, transform_indices = @transform_3, window_bounds = array<i64: 384, 128>}, {pipeline_mode = #tpu.pipeline_mode<synchronous>, transform_indices = @transform_4, window_bounds = array<i64: 1, 128>}, {transform_indices = @transform_5, window_bounds = array<i64: 128, 128>}]} {
    %c0 = arith.constant 0 : index
    %c0_0 = arith.constant 0 : index
    %0 = vector.load %arg1[%c0, %c0_0] : memref<128x128xbf16, #tpu.memory_space<vmem>>, vector<128x128xbf16>
    %c0_1 = arith.constant 0 : index
    %c0_2 = arith.constant 0 : index
    %1 = vector.load %arg3[%c0_1, %c0_2] : memref<128x128xbf16, #tpu.memory_space<vmem>>, vector<128x128xbf16>
    %cst = arith.constant dense<0.000000e+00> : vector<128x128xf32>
    %2 = tpu.matmul %0, %1, %cst {dimension_numbers = #tpu.dot_dimension_numbers<[1], [0], [0], [1], [0, 0, 1, 1], [], []>} : vector<128x128xbf16>, vector<128x128xbf16>, vector<128x128xf32> -> vector<128x128xf32>
    %3 = arith.truncf %2 : vector<128x128xf32> to vector<128x128xbf16>
    %c128_i32 = arith.constant 128 : i32
    %4 = arith.muli %arg0, %c128_i32 : i32
    %5 = tpu.assume_multiple %4, 128 : i32
    %6 = arith.index_cast %5 : i32 to index
    %c0_3 = arith.constant 0 : index
    %7 = vector.load %arg3[%6, %c0_3] : memref<128x128xbf16, #tpu.memory_space<vmem>>, vector<128x128xbf16>
    %c0_4 = arith.constant 0 : index
    %c0_5 = arith.constant 0 : index
    %8 = vector.load %arg2[%c0_4, %c0_5] : memref<128x128xbf16, #tpu.memory_space<vmem>>, vector<128x128xbf16>
    %9 = tpu.concatenate %8, %7, %3 in 1 : vector<128x128xbf16>, vector<128x128xbf16>, vector<128x128xbf16> -> vector<128x384xbf16>
    %c0_6 = arith.constant 0 : index
    %c0_7 = arith.constant 0 : index
    %10 = vector.load %arg4[%c0_6, %c0_7] : memref<384x128xbf16, #tpu.memory_space<vmem>>, vector<384x128xbf16>
    %cst_8 = arith.constant dense<0.000000e+00> : vector<128x128xf32>
    %11 = tpu.matmul %9, %10, %cst_8 {dimension_numbers = #tpu.dot_dimension_numbers<[1], [0], [0], [1], [0, 0, 1, 1], [], []>} : vector<128x384xbf16>, vector<384x128xbf16>, vector<128x128xf32> -> vector<128x128xf32>
    %c0_9 = arith.constant 0 : index
    %c0_10 = arith.constant 0 : index
    %12 = vector.load %arg5[%c0_9, %c0_10] : memref<1x128xf32, #tpu.memory_space<vmem>>, vector<1x128xf32>
    %13 = vector.broadcast %12 : vector<1x128xf32> to vector<128x128xf32>
    %14 = arith.addf %11, %13 : vector<128x128xf32>
    %cst_11 = arith.constant 0.000000e+00 : f32
    %15 = vector.broadcast %cst_11 : f32 to vector<128x128xf32>
    %16 = arith.maximumf %14, %15 : vector<128x128xf32>
    %17 = arith.truncf %16 : vector<128x128xf32> to vector<128x128xbf16>
    %c0_12 = arith.constant 0 : index
    %c0_13 = arith.constant 0 : index
    %18 = vector.load %arg6[%c0_12, %c0_13] : memref<128x128xbf16, #tpu.memory_space<vmem>>, vector<128x128xbf16>
    tpu.vector_store %arg6[%c0_12, %c0_13], %17 {strides = array<i32>} : memref<128x128xbf16, #tpu.memory_space<vmem>>, vector<128x128xbf16>,
    return
  }
  func.func @transform_0(%arg0: i32) -> (i32, i32) {
    %c0_i32 = arith.constant 0 : i32
    %c0_i32_0 = arith.constant 0 : i32
    return %arg0, %c0_i32 : i32, i32
  }
  func.func @transform_1(%arg0: i32) -> (i32, i32) {
    %c0_i32 = arith.constant 0 : i32
    %c0_i32_0 = arith.constant 0 : i32
    return %arg0, %c0_i32 : i32, i32
  }
  func.func @transform_2(%arg0: i32) -> (i32, i32) {
    %c0_i32 = arith.constant 0 : i32
    %c0_i32_0 = arith.constant 0 : i32
    %c0_i32_1 = arith.constant 0 : i32
    return %c0_i32, %c0_i32_0 : i32, i32
  }
  func.func @transform_3(%arg0: i32) -> (i32, i32) {
    %c0_i32 = arith.constant 0 : i32
    %c0_i32_0 = arith.constant 0 : i32
    %c0_i32_1 = arith.constant 0 : i32
    return %c0_i32, %c0_i32_0 : i32, i32
  }
  func.func @transform_4(%arg0: i32) -> (i32, i32) {
    %c0_i32 = arith.constant 0 : i32
    %c0_i32_0 = arith.constant 0 : i32
    %c0_i32_1 = arith.constant 0 : i32
    return %c0_i32, %c0_i32_0 : i32, i32
  }
  func.func @transform_5(%arg0: i32) -> (i32, i32) {
    %c0_i32 = arith.constant 0 : i32
    %c0_i32_0 = arith.constant 0 : i32
    return %arg0, %c0_i32 : i32, i32
  }
}

module attributes {stable_mosaic.version = 11 : i64} {
  func.func @_hop_kernel(%arg0: i32, %arg1: memref<128x128xbf16, #tpu.memory_space<vmem>>, %arg2: memref<128x128xbf16, #tpu.memory_space<vmem>>, %arg3: memref<128x128xbf16, #tpu.memory_space<vmem>>) attributes {dimension_semantics = [#tpu.dimension_semantics<parallel>], iteration_bounds = array<i64: 1>, scalar_prefetch = 0 : i64, scratch_operands = 0 : i64, tpu.core_type = #tpu.core_type<tc>, window_params = [{transform_indices = @transform_0, window_bounds = array<i64: 128, 128>}, {pipeline_mode = #tpu.pipeline_mode<synchronous>, transform_indices = @transform_1, window_bounds = array<i64: 128, 128>}, {transform_indices = @transform_2, window_bounds = array<i64: 128, 128>}]} {
    %c0 = arith.constant 0 : index
    %c0_0 = arith.constant 0 : index
    %0 = vector.load %arg1[%c0, %c0_0] : memref<128x128xbf16, #tpu.memory_space<vmem>>, vector<128x128xbf16>
    %c0_1 = arith.constant 0 : index
    %c0_2 = arith.constant 0 : index
    %1 = vector.load %arg2[%c0_1, %c0_2] : memref<128x128xbf16, #tpu.memory_space<vmem>>, vector<128x128xbf16>
    %cst = arith.constant dense<0.000000e+00> : vector<128x128xf32>
    %2 = tpu.matmul %0, %1, %cst {dimension_numbers = #tpu.dot_dimension_numbers<[1], [0], [0], [1], [0, 0, 1, 1], [], []>} : vector<128x128xbf16>, vector<128x128xbf16>, vector<128x128xf32> -> vector<128x128xf32>
    %3 = arith.truncf %2 : vector<128x128xf32> to vector<128x128xbf16>
    %c0_3 = arith.constant 0 : index
    %c0_4 = arith.constant 0 : index
    %4 = vector.load %arg3[%c0_3, %c0_4] : memref<128x128xbf16, #tpu.memory_space<vmem>>, vector<128x128xbf16>
    tpu.vector_store %arg3[%c0_3, %c0_4], %3 {strides = array<i32>} : memref<128x128xbf16, #tpu.memory_space<vmem>>, vector<128x128xbf16>,
    return
  }
  func.func @transform_0(%arg0: i32) -> (i32, i32) {
    %c0_i32 = arith.constant 0 : i32
    %c0_i32_0 = arith.constant 0 : i32
    return %arg0, %c0_i32 : i32, i32
  }
  func.func @transform_1(%arg0: i32) -> (i32, i32) {
    %c0_i32 = arith.constant 0 : i32
    %c0_i32_0 = arith.constant 0 : i32
    %c0_i32_1 = arith.constant 0 : i32
    return %c0_i32, %c0_i32_0 : i32, i32
  }
  func.func @transform_2(%arg0: i32) -> (i32, i32) {
    %c0_i32 = arith.constant 0 : i32
    %c0_i32_0 = arith.constant 0 : i32
    return %arg0, %c0_i32 : i32, i32
  }
}

module attributes {stable_mosaic.version = 11 : i64} {
  func.func @_hop_project_kernel(%arg0: i32, %arg1: memref<128x128xbf16, #tpu.memory_space<vmem>>, %arg2: memref<128x128xbf16, #tpu.memory_space<vmem>>, %arg3: memref<128x128xbf16, #tpu.memory_space<vmem>>, %arg4: memref<384x128xbf16, #tpu.memory_space<vmem>>, %arg5: memref<1x128xf32, #tpu.memory_space<vmem>>, %arg6: memref<128x128xbf16, #tpu.memory_space<vmem>>) attributes {dimension_semantics = [#tpu.dimension_semantics<parallel>], iteration_bounds = array<i64: 1>, scalar_prefetch = 0 : i64, scratch_operands = 0 : i64, tpu.core_type = #tpu.core_type<tc>, window_params = [{transform_indices = @transform_0, window_bounds = array<i64: 128, 128>}, {transform_indices = @transform_1, window_bounds = array<i64: 128, 128>}, {pipeline_mode = #tpu.pipeline_mode<synchronous>, transform_indices = @transform_2, window_bounds = array<i64: 128, 128>}, {pipeline_mode = #tpu.pipeline_mode<synchronous>, transform_indices = @transform_3, window_bounds = array<i64: 384, 128>}, {pipeline_mode = #tpu.pipeline_mode<synchronous>, transform_indices = @transform_4, window_bounds = array<i64: 1, 128>}, {transform_indices = @transform_5, window_bounds = array<i64: 128, 128>}]} {
    %c0 = arith.constant 0 : index
    %c0_0 = arith.constant 0 : index
    %0 = vector.load %arg1[%c0, %c0_0] : memref<128x128xbf16, #tpu.memory_space<vmem>>, vector<128x128xbf16>
    %c0_1 = arith.constant 0 : index
    %c0_2 = arith.constant 0 : index
    %1 = vector.load %arg3[%c0_1, %c0_2] : memref<128x128xbf16, #tpu.memory_space<vmem>>, vector<128x128xbf16>
    %cst = arith.constant dense<0.000000e+00> : vector<128x128xf32>
    %2 = tpu.matmul %0, %1, %cst {dimension_numbers = #tpu.dot_dimension_numbers<[1], [0], [0], [1], [0, 0, 1, 1], [], []>} : vector<128x128xbf16>, vector<128x128xbf16>, vector<128x128xf32> -> vector<128x128xf32>
    %3 = arith.truncf %2 : vector<128x128xf32> to vector<128x128xbf16>
    %c128_i32 = arith.constant 128 : i32
    %4 = arith.muli %arg0, %c128_i32 : i32
    %5 = tpu.assume_multiple %4, 128 : i32
    %6 = arith.index_cast %5 : i32 to index
    %c0_3 = arith.constant 0 : index
    %7 = vector.load %arg3[%6, %c0_3] : memref<128x128xbf16, #tpu.memory_space<vmem>>, vector<128x128xbf16>
    %c0_4 = arith.constant 0 : index
    %c0_5 = arith.constant 0 : index
    %8 = vector.load %arg2[%c0_4, %c0_5] : memref<128x128xbf16, #tpu.memory_space<vmem>>, vector<128x128xbf16>
    %9 = tpu.concatenate %8, %7, %3 in 1 : vector<128x128xbf16>, vector<128x128xbf16>, vector<128x128xbf16> -> vector<128x384xbf16>
    %c0_6 = arith.constant 0 : index
    %c0_7 = arith.constant 0 : index
    %10 = vector.load %arg4[%c0_6, %c0_7] : memref<384x128xbf16, #tpu.memory_space<vmem>>, vector<384x128xbf16>
    %cst_8 = arith.constant dense<0.000000e+00> : vector<128x128xf32>
    %11 = tpu.matmul %9, %10, %cst_8 {dimension_numbers = #tpu.dot_dimension_numbers<[1], [0], [0], [1], [0, 0, 1, 1], [], []>} : vector<128x384xbf16>, vector<384x128xbf16>, vector<128x128xf32> -> vector<128x128xf32>
    %c0_9 = arith.constant 0 : index
    %c0_10 = arith.constant 0 : index
    %12 = vector.load %arg5[%c0_9, %c0_10] : memref<1x128xf32, #tpu.memory_space<vmem>>, vector<1x128xf32>
    %13 = vector.broadcast %12 : vector<1x128xf32> to vector<128x128xf32>
    %14 = arith.addf %11, %13 : vector<128x128xf32>
    %cst_11 = arith.constant 0.000000e+00 : f32
    %15 = vector.broadcast %cst_11 : f32 to vector<128x128xf32>
    %16 = arith.maximumf %14, %15 : vector<128x128xf32>
    %17 = arith.truncf %16 : vector<128x128xf32> to vector<128x128xbf16>
    %c0_12 = arith.constant 0 : index
    %c0_13 = arith.constant 0 : index
    %18 = vector.load %arg6[%c0_12, %c0_13] : memref<128x128xbf16, #tpu.memory_space<vmem>>, vector<128x128xbf16>
    tpu.vector_store %arg6[%c0_12, %c0_13], %17 {strides = array<i32>} : memref<128x128xbf16, #tpu.memory_space<vmem>>, vector<128x128xbf16>,
    return
  }
  func.func @transform_0(%arg0: i32) -> (i32, i32) {
    %c0_i32 = arith.constant 0 : i32
    %c0_i32_0 = arith.constant 0 : i32
    return %arg0, %c0_i32 : i32, i32
  }
  func.func @transform_1(%arg0: i32) -> (i32, i32) {
    %c0_i32 = arith.constant 0 : i32
    %c0_i32_0 = arith.constant 0 : i32
    return %arg0, %c0_i32 : i32, i32
  }
  func.func @transform_2(%arg0: i32) -> (i32, i32) {
    %c0_i32 = arith.constant 0 : i32
    %c0_i32_0 = arith.constant 0 : i32
    %c0_i32_1 = arith.constant 0 : i32
    return %c0_i32, %c0_i32_0 : i32, i32
  }
  func.func @transform_3(%arg0: i32) -> (i32, i32) {
    %c0_i32 = arith.constant 0 : i32
    %c0_i32_0 = arith.constant 0 : i32
    %c0_i32_1 = arith.constant 0 : i32
    return %c0_i32, %c0_i32_0 : i32, i32
  }
  func.func @transform_4(%arg0: i32) -> (i32, i32) {
    %c0_i32 = arith.constant 0 : i32
    %c0_i32_0 = arith.constant 0 : i32
    %c0_i32_1 = arith.constant 0 : i32
    return %c0_i32, %c0_i32_0 : i32, i32
  }
  func.func @transform_5(%arg0: i32) -> (i32, i32) {
    %c0_i32 = arith.constant 0 : i32
    %c0_i32_0 = arith.constant 0 : i32
    return %arg0, %c0_i32 : i32, i32
  }
}

module attributes {stable_mosaic.version = 11 : i64} {
  func.func @_hop_kernel(%arg0: i32, %arg1: memref<128x128xbf16, #tpu.memory_space<vmem>>, %arg2: memref<128x128xbf16, #tpu.memory_space<vmem>>, %arg3: memref<128x128xbf16, #tpu.memory_space<vmem>>) attributes {dimension_semantics = [#tpu.dimension_semantics<parallel>], iteration_bounds = array<i64: 1>, scalar_prefetch = 0 : i64, scratch_operands = 0 : i64, tpu.core_type = #tpu.core_type<tc>, window_params = [{transform_indices = @transform_0, window_bounds = array<i64: 128, 128>}, {pipeline_mode = #tpu.pipeline_mode<synchronous>, transform_indices = @transform_1, window_bounds = array<i64: 128, 128>}, {transform_indices = @transform_2, window_bounds = array<i64: 128, 128>}]} {
    %c0 = arith.constant 0 : index
    %c0_0 = arith.constant 0 : index
    %0 = vector.load %arg1[%c0, %c0_0] : memref<128x128xbf16, #tpu.memory_space<vmem>>, vector<128x128xbf16>
    %c0_1 = arith.constant 0 : index
    %c0_2 = arith.constant 0 : index
    %1 = vector.load %arg2[%c0_1, %c0_2] : memref<128x128xbf16, #tpu.memory_space<vmem>>, vector<128x128xbf16>
    %cst = arith.constant dense<0.000000e+00> : vector<128x128xf32>
    %2 = tpu.matmul %0, %1, %cst {dimension_numbers = #tpu.dot_dimension_numbers<[1], [0], [0], [1], [0, 0, 1, 1], [], []>} : vector<128x128xbf16>, vector<128x128xbf16>, vector<128x128xf32> -> vector<128x128xf32>
    %3 = arith.truncf %2 : vector<128x128xf32> to vector<128x128xbf16>
    %c0_3 = arith.constant 0 : index
    %c0_4 = arith.constant 0 : index
    %4 = vector.load %arg3[%c0_3, %c0_4] : memref<128x128xbf16, #tpu.memory_space<vmem>>, vector<128x128xbf16>
    tpu.vector_store %arg3[%c0_3, %c0_4], %3 {strides = array<i32>} : memref<128x128xbf16, #tpu.memory_space<vmem>>, vector<128x128xbf16>,
    return
  }
  func.func @transform_0(%arg0: i32) -> (i32, i32) {
    %c0_i32 = arith.constant 0 : i32
    %c0_i32_0 = arith.constant 0 : i32
    return %arg0, %c0_i32 : i32, i32
  }
  func.func @transform_1(%arg0: i32) -> (i32, i32) {
    %c0_i32 = arith.constant 0 : i32
    %c0_i32_0 = arith.constant 0 : i32
    %c0_i32_1 = arith.constant 0 : i32
    return %c0_i32, %c0_i32_0 : i32, i32
  }
  func.func @transform_2(%arg0: i32) -> (i32, i32) {
    %c0_i32 = arith.constant 0 : i32
    %c0_i32_0 = arith.constant 0 : i32
    return %arg0, %c0_i32 : i32, i32
  }
}

module attributes {stable_mosaic.version = 11 : i64} {
  func.func @_hop_project_kernel(%arg0: i32, %arg1: memref<128x128xbf16, #tpu.memory_space<vmem>>, %arg2: memref<128x128xbf16, #tpu.memory_space<vmem>>, %arg3: memref<128x128xbf16, #tpu.memory_space<vmem>>, %arg4: memref<384x128xbf16, #tpu.memory_space<vmem>>, %arg5: memref<1x128xf32, #tpu.memory_space<vmem>>, %arg6: memref<128x128xf32, #tpu.memory_space<vmem>>) attributes {dimension_semantics = [#tpu.dimension_semantics<parallel>], iteration_bounds = array<i64: 1>, scalar_prefetch = 0 : i64, scratch_operands = 0 : i64, tpu.core_type = #tpu.core_type<tc>, window_params = [{transform_indices = @transform_0, window_bounds = array<i64: 128, 128>}, {transform_indices = @transform_1, window_bounds = array<i64: 128, 128>}, {pipeline_mode = #tpu.pipeline_mode<synchronous>, transform_indices = @transform_2, window_bounds = array<i64: 128, 128>}, {pipeline_mode = #tpu.pipeline_mode<synchronous>, transform_indices = @transform_3, window_bounds = array<i64: 384, 128>}, {pipeline_mode = #tpu.pipeline_mode<synchronous>, transform_indices = @transform_4, window_bounds = array<i64: 1, 128>}, {transform_indices = @transform_5, window_bounds = array<i64: 128, 128>}]} {
    %c0 = arith.constant 0 : index
    %c0_0 = arith.constant 0 : index
    %0 = vector.load %arg1[%c0, %c0_0] : memref<128x128xbf16, #tpu.memory_space<vmem>>, vector<128x128xbf16>
    %c0_1 = arith.constant 0 : index
    %c0_2 = arith.constant 0 : index
    %1 = vector.load %arg3[%c0_1, %c0_2] : memref<128x128xbf16, #tpu.memory_space<vmem>>, vector<128x128xbf16>
    %cst = arith.constant dense<0.000000e+00> : vector<128x128xf32>
    %2 = tpu.matmul %0, %1, %cst {dimension_numbers = #tpu.dot_dimension_numbers<[1], [0], [0], [1], [0, 0, 1, 1], [], []>} : vector<128x128xbf16>, vector<128x128xbf16>, vector<128x128xf32> -> vector<128x128xf32>
    %3 = arith.truncf %2 : vector<128x128xf32> to vector<128x128xbf16>
    %c128_i32 = arith.constant 128 : i32
    %4 = arith.muli %arg0, %c128_i32 : i32
    %5 = tpu.assume_multiple %4, 128 : i32
    %6 = arith.index_cast %5 : i32 to index
    %c0_3 = arith.constant 0 : index
    %7 = vector.load %arg3[%6, %c0_3] : memref<128x128xbf16, #tpu.memory_space<vmem>>, vector<128x128xbf16>
    %c0_4 = arith.constant 0 : index
    %c0_5 = arith.constant 0 : index
    %8 = vector.load %arg2[%c0_4, %c0_5] : memref<128x128xbf16, #tpu.memory_space<vmem>>, vector<128x128xbf16>
    %9 = tpu.concatenate %8, %7, %3 in 1 : vector<128x128xbf16>, vector<128x128xbf16>, vector<128x128xbf16> -> vector<128x384xbf16>
    %c0_6 = arith.constant 0 : index
    %c0_7 = arith.constant 0 : index
    %10 = vector.load %arg4[%c0_6, %c0_7] : memref<384x128xbf16, #tpu.memory_space<vmem>>, vector<384x128xbf16>
    %cst_8 = arith.constant dense<0.000000e+00> : vector<128x128xf32>
    %11 = tpu.matmul %9, %10, %cst_8 {dimension_numbers = #tpu.dot_dimension_numbers<[1], [0], [0], [1], [0, 0, 1, 1], [], []>} : vector<128x384xbf16>, vector<384x128xbf16>, vector<128x128xf32> -> vector<128x128xf32>
    %c0_9 = arith.constant 0 : index
    %c0_10 = arith.constant 0 : index
    %12 = vector.load %arg5[%c0_9, %c0_10] : memref<1x128xf32, #tpu.memory_space<vmem>>, vector<1x128xf32>
    %13 = vector.broadcast %12 : vector<1x128xf32> to vector<128x128xf32>
    %14 = arith.addf %11, %13 : vector<128x128xf32>
    %c0_11 = arith.constant 0 : index
    %c0_12 = arith.constant 0 : index
    %15 = vector.load %arg6[%c0_11, %c0_12] : memref<128x128xf32, #tpu.memory_space<vmem>>, vector<128x128xf32>
    tpu.vector_store %arg6[%c0_11, %c0_12], %14 {strides = array<i32>} : memref<128x128xf32, #tpu.memory_space<vmem>>, vector<128x128xf32>,
    return
  }
  func.func @transform_0(%arg0: i32) -> (i32, i32) {
    %c0_i32 = arith.constant 0 : i32
    %c0_i32_0 = arith.constant 0 : i32
    return %arg0, %c0_i32 : i32, i32
  }
  func.func @transform_1(%arg0: i32) -> (i32, i32) {
    %c0_i32 = arith.constant 0 : i32
    %c0_i32_0 = arith.constant 0 : i32
    return %arg0, %c0_i32 : i32, i32
  }
  func.func @transform_2(%arg0: i32) -> (i32, i32) {
    %c0_i32 = arith.constant 0 : i32
    %c0_i32_0 = arith.constant 0 : i32
    %c0_i32_1 = arith.constant 0 : i32
    return %c0_i32, %c0_i32_0 : i32, i32
  }
  func.func @transform_3(%arg0: i32) -> (i32, i32) {
    %c0_i32 = arith.constant 0 : i32
    %c0_i32_0 = arith.constant 0 : i32
    %c0_i32_1 = arith.constant 0 : i32
    return %c0_i32, %c0_i32_0 : i32, i32
  }
  func.func @transform_4(%arg0: i32) -> (i32, i32) {
    %c0_i32 = arith.constant 0 : i32
    %c0_i32_0 = arith.constant 0 : i32
    %c0_i32_1 = arith.constant 0 : i32
    return %c0_i32, %c0_i32_0 : i32, i32
  }
  func.func @transform_5(%arg0: i32) -> (i32, i32) {
    %c0_i32 = arith.constant 0 : i32
    %c0_i32_0 = arith.constant 0 : i32
    return %arg0, %c0_i32 : i32, i32
  }
}

</mosaic_0001>

<bundles_post_ra>
// kernel: tagcn_forward.6
= control target key start
LH: loop header
LB: loop body
LE: loop exit
PB: predicated region body
PF: predicated region fallthrough
CT: control target
= control target key end

     0   :  { %7 = vsyncpa [#allocation3], 0  ;;  %s623_s0 = inlined_call_operand.hbm [shape: bf16[128,128], index: 0, kind: input, shape index: {}]   ;;  %s624_s1 = inlined_call_operand.hbm [shape: bf16[128,128], index: 1, kind: input, shape index: {}]   ;;  %s625_s2 = inlined_call_operand.vmem [shape: bf16[128,128], index: 2, kind: output, shape index: {}]  }
   0x1   :  { %8 = vsyncpa [#allocation5], 0  ;;  %s574_s9 = smov [#allocation2]  }
   0x2   :  { %s14_s10 = sshll.u32 %s574_s9, 4  ;;  %s15_s10 = int_to_ptr.vmem [resolvable:$true] %s14_s10 }
   0x3   :  { %s538_s11 = scalar_lea.vmem %s15_s10, 1024  ;;  %p543_p1 = scmp.lt.s32.totalorder %s15_s10, %s15_s10 }
   0x4   :  { %p539_p0 = scmp.ne.s32.totalorder %s15_s10, %s538_s11  ;;  %p544_p2 = scmp.lt.s32.totalorder %s538_s11, %s538_s11 }
   0x6   :  { %p545_p3 = por %p544_p2, %p543_p1 }
   0x8   :  { %p546_p4 = pnand %p545_p3, %p539_p0 }
   0xa   :  { %549 = shalt.err (!%p546_p4)
}
   0xb   :  { %s575_s12 = smov 64   ;;  %s576_s13 = smov 4  }
   0xc   :  { %20 = dma.hbm_to_vmem [thread:$0]  %s623_s0, 1024, %s15_s10, [#allocation3], %s575_s12, %s575_s12, %s576_s13  }
   0xd   :  { %s577_s16 = smov [#allocation4]  }
   0xe   :  { %s26_s17 = sshll.u32 %s577_s16, 4  ;;  %s27_s17 = int_to_ptr.vmem [resolvable:$true] %s26_s17 }
   0xf   :  { %s558_s18 = scalar_lea.vmem %s27_s17, 1024  ;;  %p563_p6 = scmp.lt.s32.totalorder %s27_s17, %s27_s17 }
  0x10   :  { %p559_p5 = scmp.ne.s32.totalorder %s27_s17, %s558_s18  ;;  %p564_p7 = scmp.lt.s32.totalorder %s558_s18, %s558_s18 }
  0x12   :  { %p565_p8 = por %p564_p7, %p563_p6 }
  0x14   :  { %p566_p9 = pnand %p565_p8, %p559_p5 }
  0x16   :  { %569 = shalt.err (!%p566_p9)
}
  0x17   :  { %32 = dma.hbm_to_vmem [thread:$0]  %s624_s1, 1024, %s27_s17, [#allocation5], %s575_s12, %s575_s12, %s576_s13  }
  0x18   :  { %570 = dma.done.wait [#allocation3], 1024  }
  0x19   :  { %571 = vsyncadd [#allocation3], 4294966272 }
  0x1a   :  { %572 = dma.done.wait [#allocation5], 1024  }
  0x1b   :  { %573 = vsyncadd [#allocation5], 4294966272  ;;  %v514_v0 = vld [vmem:[#allocation4 + $0x38] sm:$0xff]   ;;  %v515_v1 = vld [vmem:[#allocation4 + $0x30] sm:$0xff]  }
  0x1c   :  { %462 = vmatprep.subr.bf16.mxu0 %v514_v0  ;;  %494 = vmatprep.subr.bf16.mxu1 %v514_v0  ;;  %v516_v2 = vld [vmem:[#allocation4 + $0x28] sm:$0xff]   ;;  %v517_v3 = vld [vmem:[#allocation4 + $0x20] sm:$0xff]   ;;  %v518_v6 = vld [vmem:[#allocation4 + $0x18] sm:$0xff]  }
  0x1d   :  { %463 = vmatpush3.bf16.msra.mxu0 %v514_v0  ;;  %502 = vmatpush3.bf16.msra.mxu1 %v514_v0  ;;  %v522_v4 = vld [vmem:[#allocation2] sm:$0xff]   ;;  %v519_v7 = vld [vmem:[#allocation4 + $0x10] sm:$0xff]   ;;  %v520_v8 = vld [vmem:[#allocation4 + $0x8] sm:$0xff]  }
  0x1e   :  { %464 = vmatprep.subr.bf16.mxu0 %v515_v1  ;;  %495 = vmatprep.subr.bf16.mxu1 %v515_v1  ;;  %v523_v5 = vld [vmem:[#allocation2 + $0x20] sm:$0xff]   ;;  %v524_v10 = vld [vmem:[#allocation2 + $0x8] sm:$0xff]   ;;  %v526_v12 = vld [vmem:[#allocation2 + $0x10] sm:$0xff]  }
  0x1f   :  { %478 = vmatprep.mubr.bf16.mxu0 %v522_v4  ;;  %486 = vmatprep.mubr.bf16.mxu1 %v523_v5  ;;  %v521_v9 = vld [vmem:[#allocation4] sm:$0xff]   ;;  %v525_v11 = vld [vmem:[#allocation2 + $0x28] sm:$0xff]   ;;  %v527_v13 = vld [vmem:[#allocation2 + $0x30] sm:$0xff]  }
  0x20   :  { %v528_v14 = vld [vmem:[#allocation2 + $0x18] sm:$0xff]  }
  0x21   :  { %465 = vmatpush3.bf16.msra.mxu0 %v515_v1  ;;  %503 = vmatpush3.bf16.msra.mxu1 %v515_v1  ;;  %v529_v15 = vld [vmem:[#allocation2 + $0x38] sm:$0xff]  }
  0x22   :  { %466 = vmatprep.subr.bf16.mxu0 %v516_v2  ;;  %496 = vmatprep.subr.bf16.mxu1 %v516_v2 }
  0x25   :  { %467 = vmatpush3.bf16.msra.mxu0 %v516_v2  ;;  %504 = vmatpush3.bf16.msra.mxu1 %v516_v2 }
  0x26   :  { %468 = vmatprep.subr.bf16.mxu0 %v517_v3  ;;  %497 = vmatprep.subr.bf16.mxu1 %v517_v3 }
  0x29   :  { %469 = vmatpush3.bf16.msra.mxu0 %v517_v3  ;;  %505 = vmatpush3.bf16.msra.mxu1 %v517_v3 }
  0x2a   :  { %470 = vmatprep.subr.bf16.mxu0 %v518_v6  ;;  %498 = vmatprep.subr.bf16.mxu1 %v518_v6 }
  0x2d   :  { %471 = vmatpush3.bf16.msra.mxu0 %v518_v6  ;;  %506 = vmatpush3.bf16.msra.mxu1 %v518_v6 }
  0x2e   :  { %472 = vmatprep.subr.bf16.mxu0 %v519_v7  ;;  %499 = vmatprep.subr.bf16.mxu1 %v519_v7 }
  0x31   :  { %473 = vmatpush3.bf16.msra.mxu0 %v519_v7  ;;  %507 = vmatpush3.bf16.msra.mxu1 %v519_v7 }
  0x32   :  { %474 = vmatprep.subr.bf16.mxu0 %v520_v8  ;;  %500 = vmatprep.subr.bf16.mxu1 %v520_v8 }
  0x35   :  { %475 = vmatpush3.bf16.msra.mxu0 %v520_v8  ;;  %508 = vmatpush3.bf16.msra.mxu1 %v520_v8 }
  0x36   :  { %476 = vmatprep.subr.bf16.mxu0 %v521_v9  ;;  %501 = vmatprep.subr.bf16.mxu1 %v521_v9 }
  0x39   :  { %477 = vmatpush3.bf16.msra.mxu0 %v521_v9  ;;  %509 = vmatpush3.bf16.msra.mxu1 %v521_v9 }
  0x3c   :  { %479 = vmatmul.mubr.bf16.vlgmr.msra.gmra.mxu0 %v524_v10  ;;  %487 = vmatmul.mubr.bf16.vlgmr.msra.gmra.mxu1 %v525_v11 }
  0x3d   :  { %482 = vmatprep.mubr.bf16.mxu0 %v526_v12  ;;  %490 = vmatprep.mubr.bf16.mxu1 %v527_v13 }
  0x44   :  { %483 = vmatmul.mubr.bf16.gmra.mxu0 %v528_v14  ;;  %491 = vmatmul.mubr.bf16.gmra.mxu1 %v529_v15 }
  0xfc   :  { %v480_v16 = vpop.f32.mrf.mxu0  ;;  %v488_v17 = vpop.f32.mrf.mxu1 }
  0xfe   :  { %v202_v18 = vpop.f32.mrf.mxu0  ;;  %v234_v19 = vpop.f32.mrf.mxu1 }
 0x100   :  { %v481_v20 = vpop.f32.mrf.mxu0  ;;  %v489_v21 = vpop.f32.mrf.mxu1 }
 0x101   :  { %v407_v22 = vpack.c.bf16 %v481_v20, %v480_v16  ;;  %v427_v23 = vpack.c.bf16 %v489_v21, %v488_v17 }
 0x102   :  { %v205_v24 = vpop.f32.mrf.mxu0  ;;  %v237_v25 = vpop.f32.mrf.mxu1 }
 0x103   :  { %439 = vst [vmem:[%s625_s2 + $0x8] sm:$0xff] %v407_v22   ;;  %443 = vst [vmem:[%s625_s2 + $0x28] sm:$0xff] %v427_v23   ;;  %v402_v26 = vpack.c.bf16 %v205_v24, %v202_v18  ;;  %v422_v27 = vpack.c.bf16 %v237_v25, %v234_v19 }
 0x104   :  { %v484_v28 = vpop.f32.mrf.mxu0  ;;  %v492_v29 = vpop.f32.mrf.mxu1 }
 0x105   :  { %403 = vst [vmem:[%s625_s2] sm:$0xff] %v402_v26   ;;  %442 = vst [vmem:[%s625_s2 + $0x20] sm:$0xff] %v422_v27  }
 0x106   :  { %v218_v30 = vpop.f32.mrf.mxu0  ;;  %v250_v31 = vpop.f32.mrf.mxu1 }
 0x108   :  { %v485_v32 = vpop.f32.mrf.mxu0  ;;  %v493_v33 = vpop.f32.mrf.mxu1 }
 0x109   :  { %v417_v34 = vpack.c.bf16 %v485_v32, %v484_v28  ;;  %v437_v35 = vpack.c.bf16 %v493_v33, %v492_v29 }
 0x10a   :  { %v221_v36 = vpop.f32.mrf.mxu0  ;;  %v253_v37 = vpop.f32.mrf.mxu1 }
 0x10b   :  { %441 = vst [vmem:[%s625_s2 + $0x18] sm:$0xff] %v417_v34   ;;  %445 = vst [vmem:[%s625_s2 + $0x38] sm:$0xff] %v437_v35   ;;  %v412_v38 = vpack.c.bf16 %v221_v36, %v218_v30  ;;  %v432_v39 = vpack.c.bf16 %v253_v37, %v250_v31 }
 0x10d   :  { %440 = vst [vmem:[%s625_s2 + $0x10] sm:$0xff] %v412_v38   ;;  %444 = vst [vmem:[%s625_s2 + $0x30] sm:$0xff] %v432_v39  }
 0x10e   :  { %349 = vsyncpa [#allocation3], 1 }
 0x10f   :  { %350 = vsyncpa [#allocation5], 1 }

// kernel: tagcn_forward.8
= control target key start
LH: loop header
LB: loop body
LE: loop exit
PB: predicated region body
PF: predicated region fallthrough
CT: control target
= control target key end

     0   :  { %s583_s1 = inlined_call_operand.vmem [shape: bf16[128,128], index: 1, kind: input, shape index: {}]   ;;  %s584_s0 = inlined_call_operand.vmem [shape: bf16[128,128], index: 0, kind: input, shape index: {}]   ;;  %s585_s2 = inlined_call_operand.vmem [shape: bf16[128,128], index: 2, kind: output, shape index: {}]  }
   0x1   :  { %v480_v0 = vld [vmem:[%s583_s1 + $0x38] sm:$0xff]   ;;  %v481_v1 = vld [vmem:[%s583_s1 + $0x30] sm:$0xff]   ;;  %v482_v2 = vld [vmem:[%s583_s1 + $0x28] sm:$0xff]  }
   0x2   :  { %432 = vmatprep.subr.bf16.mxu0 %v480_v0  ;;  %464 = vmatprep.subr.bf16.mxu1 %v480_v0  ;;  %v483_v3 = vld [vmem:[%s583_s1 + $0x20] sm:$0xff]   ;;  %v484_v6 = vld [vmem:[%s583_s1 + $0x18] sm:$0xff]   ;;  %v485_v7 = vld [vmem:[%s583_s1 + $0x10] sm:$0xff]  }
   0x3   :  { %433 = vmatpush3.bf16.msra.mxu0 %v480_v0  ;;  %472 = vmatpush3.bf16.msra.mxu1 %v480_v0  ;;  %v488_v4 = vld [vmem:[%s584_s0] sm:$0xff]   ;;  %v486_v8 = vld [vmem:[%s583_s1 + $0x8] sm:$0xff]   ;;  %v492_v12 = vld [vmem:[%s584_s0 + $0x10] sm:$0xff]  }
   0x4   :  { %434 = vmatprep.subr.bf16.mxu0 %v481_v1  ;;  %465 = vmatprep.subr.bf16.mxu1 %v481_v1  ;;  %v489_v5 = vld [vmem:[%s584_s0 + $0x20] sm:$0xff]   ;;  %v490_v10 = vld [vmem:[%s584_s0 + $0x8] sm:$0xff]   ;;  %v493_v13 = vld [vmem:[%s584_s0 + $0x30] sm:$0xff]  }
   0x5   :  { %448 = vmatprep.mubr.bf16.mxu0 %v488_v4  ;;  %456 = vmatprep.mubr.bf16.mxu1 %v489_v5  ;;  %v487_v9 = vld [vmem:[%s583_s1] sm:$0xff]   ;;  %v491_v11 = vld [vmem:[%s584_s0 + $0x28] sm:$0xff]   ;;  %v494_v14 = vld [vmem:[%s584_s0 + $0x18] sm:$0xff]  }
   0x6   :  { %v495_v15 = vld [vmem:[%s584_s0 + $0x38] sm:$0xff]  }
   0x7   :  { %435 = vmatpush3.bf16.msra.mxu0 %v481_v1  ;;  %473 = vmatpush3.bf16.msra.mxu1 %v481_v1 }
   0x8   :  { %436 = vmatprep.subr.bf16.mxu0 %v482_v2  ;;  %466 = vmatprep.subr.bf16.mxu1 %v482_v2 }
   0xb   :  { %437 = vmatpush3.bf16.msra.mxu0 %v482_v2  ;;  %474 = vmatpush3.bf16.msra.mxu1 %v482_v2 }
   0xc   :  { %438 = vmatprep.subr.bf16.mxu0 %v483_v3  ;;  %467 = vmatprep.subr.bf16.mxu1 %v483_v3 }
   0xf   :  { %439 = vmatpush3.bf16.msra.mxu0 %v483_v3  ;;  %475 = vmatpush3.bf16.msra.mxu1 %v483_v3 }
  0x10   :  { %440 = vmatprep.subr.bf16.mxu0 %v484_v6  ;;  %468 = vmatprep.subr.bf16.mxu1 %v484_v6 }
  0x13   :  { %441 = vmatpush3.bf16.msra.mxu0 %v484_v6  ;;  %476 = vmatpush3.bf16.msra.mxu1 %v484_v6 }
  0x14   :  { %442 = vmatprep.subr.bf16.mxu0 %v485_v7  ;;  %469 = vmatprep.subr.bf16.mxu1 %v485_v7 }
  0x17   :  { %443 = vmatpush3.bf16.msra.mxu0 %v485_v7  ;;  %477 = vmatpush3.bf16.msra.mxu1 %v485_v7 }
  0x18   :  { %444 = vmatprep.subr.bf16.mxu0 %v486_v8  ;;  %470 = vmatprep.subr.bf16.mxu1 %v486_v8 }
  0x1b   :  { %445 = vmatpush3.bf16.msra.mxu0 %v486_v8  ;;  %478 = vmatpush3.bf16.msra.mxu1 %v486_v8 }
  0x1c   :  { %446 = vmatprep.subr.bf16.mxu0 %v487_v9  ;;  %471 = vmatprep.subr.bf16.mxu1 %v487_v9 }
  0x1f   :  { %447 = vmatpush3.bf16.msra.mxu0 %v487_v9  ;;  %479 = vmatpush3.bf16.msra.mxu1 %v487_v9 }
  0x22   :  { %449 = vmatmul.mubr.bf16.vlgmr.msra.gmra.mxu0 %v490_v10  ;;  %457 = vmatmul.mubr.bf16.vlgmr.msra.gmra.mxu1 %v491_v11 }
  0x23   :  { %452 = vmatprep.mubr.bf16.mxu0 %v492_v12  ;;  %460 = vmatprep.mubr.bf16.mxu1 %v493_v13 }
  0x2a   :  { %453 = vmatmul.mubr.bf16.gmra.mxu0 %v494_v14  ;;  %461 = vmatmul.mubr.bf16.gmra.mxu1 %v495_v15 }
  0xe2   :  { %v450_v16 = vpop.f32.mrf.mxu0  ;;  %v458_v17 = vpop.f32.mrf.mxu1 }
  0xe4   :  { %v174_v18 = vpop.f32.mrf.mxu0  ;;  %v206_v19 = vpop.f32.mrf.mxu1 }
  0xe6   :  { %v451_v20 = vpop.f32.mrf.mxu0  ;;  %v459_v21 = vpop.f32.mrf.mxu1 }
  0xe7   :  { %v377_v22 = vpack.c.bf16 %v451_v20, %v450_v16  ;;  %v397_v23 = vpack.c.bf16 %v459_v21, %v458_v17 }
  0xe8   :  { %v177_v24 = vpop.f32.mrf.mxu0  ;;  %v209_v25 = vpop.f32.mrf.mxu1 }
  0xe9   :  { %409 = vst [vmem:[%s585_s2 + $0x8] sm:$0xff] %v377_v22   ;;  %413 = vst [vmem:[%s585_s2 + $0x28] sm:$0xff] %v397_v23   ;;  %v372_v26 = vpack.c.bf16 %v177_v24, %v174_v18  ;;  %v392_v27 = vpack.c.bf16 %v209_v25, %v206_v19 }
  0xea   :  { %v454_v28 = vpop.f32.mrf.mxu0  ;;  %v462_v29 = vpop.f32.mrf.mxu1 }
  0xeb   :  { %373 = vst [vmem:[%s585_s2] sm:$0xff] %v372_v26   ;;  %412 = vst [vmem:[%s585_s2 + $0x20] sm:$0xff] %v392_v27  }
  0xec   :  { %v190_v30 = vpop.f32.mrf.mxu0  ;;  %v222_v31 = vpop.f32.mrf.mxu1 }
  0xee   :  { %v455_v32 = vpop.f32.mrf.mxu0  ;;  %v463_v33 = vpop.f32.mrf.mxu1 }
  0xef   :  { %v387_v34 = vpack.c.bf16 %v455_v32, %v454_v28  ;;  %v407_v35 = vpack.c.bf16 %v463_v33, %v462_v29 }
  0xf0   :  { %v193_v36 = vpop.f32.mrf.mxu0  ;;  %v225_v37 = vpop.f32.mrf.mxu1 }
  0xf1   :  { %411 = vst [vmem:[%s585_s2 + $0x18] sm:$0xff] %v387_v34   ;;  %415 = vst [vmem:[%s585_s2 + $0x38] sm:$0xff] %v407_v35   ;;  %v382_v38 = vpack.c.bf16 %v193_v36, %v190_v30  ;;  %v402_v39 = vpack.c.bf16 %v225_v37, %v222_v31 }
  0xf3   :  { %410 = vst [vmem:[%s585_s2 + $0x10] sm:$0xff] %v382_v38   ;;  %414 = vst [vmem:[%s585_s2 + $0x30] sm:$0xff] %v402_v39  }

// kernel: tagcn_forward.9
= control target key start
LH: loop header
LB: loop body
LE: loop exit
PB: predicated region body
PF: predicated region fallthrough
CT: control target
= control target key end

     0   :  { %s1489_s2 = inlined_call_operand.vmem [shape: bf16[128,128], index: 2, kind: input, shape index: {}]   ;;  %s1490_s0 = inlined_call_operand.vmem [shape: bf16[128,128], index: 0, kind: input, shape index: {}]   ;;  %s1491_s3 = inlined_call_operand.vmem [shape: bf16[384,128], index: 3, kind: input, shape index: {}]   ;;  %s1492_s1 = inlined_call_operand.vmem [shape: bf16[128,128], index: 1, kind: input, shape index: {}]   ;;  %s1493_s4 = inlined_call_operand.vmem [shape: f32[1,128], index: 4, kind: input, shape index: {}]   ;;  %s1494_s5 = inlined_call_operand.vmem [shape: bf16[128,128], index: 5, kind: output, shape index: {}]  }
   0x1   :  { %v1178_v0 = vld [vmem:[%s1489_s2 + $0x38] sm:$0xff]   ;;  %v1179_v1 = vld [vmem:[%s1489_s2 + $0x30] sm:$0xff]   ;;  %v1180_v2 = vld [vmem:[%s1489_s2 + $0x28] sm:$0xff]  }
   0x2   :  { %1114 = vmatprep.subr.bf16.mxu0 %v1178_v0  ;;  %v1181_v3 = vld [vmem:[%s1489_s2 + $0x20] sm:$0xff]   ;;  %v1182_v5 = vld [vmem:[%s1489_s2 + $0x18] sm:$0xff]   ;;  %v1183_v6 = vld [vmem:[%s1489_s2 + $0x10] sm:$0xff]  }
   0x3   :  { %1115 = vmatpush3.bf16.msra.mxu0 %v1178_v0  ;;  %v1186_v4 = vld [vmem:[%s1490_s0] sm:$0xff]   ;;  %v1194_v7 = vld [vmem:[%s1491_s3 + $0x78] sm:$0xff]   ;;  %v1184_v9 = vld [vmem:[%s1489_s2 + $0x8] sm:$0xff]  }
   0x4   :  { %1116 = vmatprep.subr.bf16.mxu0 %v1179_v1  ;;  %1130 = vmatprep.mubr.bf16.mxu0 %v1186_v4  ;;  %v1195_v8 = vld [vmem:[%s1491_s3 + $0x38] sm:$0xff]   ;;  %v1196_v10 = vld [vmem:[%s1491_s3 + $0x70] sm:$0xff]   ;;  %v1198_v12 = vld [vmem:[%s1491_s3 + $0x68] sm:$0xff]  }
   0x5   :  { %1034 = vmatprep.subr.bf16.mxu1 %v1194_v7  ;;  %v1197_v11 = vld [vmem:[%s1491_s3 + $0x30] sm:$0xff]   ;;  %v1185_v13 = vld [vmem:[%s1489_s2] sm:$0xff]   ;;  %v1199_v14 = vld [vmem:[%s1491_s3 + $0x28] sm:$0xff]  }
   0x6   :  { %1035 = vmatpush3.bf16.msra.mxu1 %v1195_v8  ;;  %v1200_v15 = vld [vmem:[%s1491_s3 + $0x60] sm:$0xff]   ;;  %v1187_v17 = vld [vmem:[%s1490_s0 + $0x8] sm:$0xff]   ;;  %v1202_v18 = vld [vmem:[%s1491_s3 + $0x58] sm:$0xff]  }
   0x7   :  { %1117 = vmatpush3.bf16.msra.mxu0 %v1179_v1  ;;  %1036 = vmatprep.subr.bf16.mxu1 %v1196_v10  ;;  %v1201_v16 = vld [vmem:[%s1491_s3 + $0x20] sm:$0xff]   ;;  %v1188_v19 = vld [vmem:[%s1490_s0 + $0x10] sm:$0xff]   ;;  %v1203_v20 = vld [vmem:[%s1491_s3 + $0x18] sm:$0xff]  }
   0x8   :  { %1118 = vmatprep.subr.bf16.mxu0 %v1180_v2  ;;  %v1204_v21 = vld [vmem:[%s1491_s3 + $0x50] sm:$0xff]   ;;  %v1210_v22 = vld [vmem:[%s1489_s2] sm:$0xff]   ;;  %v1206_v24 = vld [vmem:[%s1491_s3 + $0x48] sm:$0xff]  }
   0x9   :  { %v1205_v23 = vld [vmem:[%s1491_s3 + $0x10] sm:$0xff]   ;;  %618 = vmatprep.mubr.bf16.mxu1 %v1210_v22  ;;  %v1189_v25 = vld [vmem:[%s1490_s0 + $0x18] sm:$0xff]   ;;  %v1190_v28 = vld [vmem:[%s1490_s0 + $0x20] sm:$0xff]  }
   0xa   :  { %1037 = vmatpush3.bf16.msra.mxu1 %v1197_v11  ;;  %v1214_v26 = vld [vmem:[%s1491_s3 + $0xb8] sm:$0xff]   ;;  %v1215_v27 = vld [vmem:[%s1491_s3 + $0xb0] sm:$0xff]   ;;  %v1207_v29 = vld [vmem:[%s1491_s3 + $0x8] sm:$0xff]  }
   0xb   :  { %1119 = vmatpush3.bf16.msra.mxu0 %v1180_v2  ;;  %1038 = vmatprep.subr.bf16.mxu1 %v1198_v12  ;;  %v1208_v30 = vld [vmem:[%s1491_s3 + $0x40] sm:$0xff]   ;;  %v1218_v31 = vld [vmem:[%s1491_s3 + $0xa8] sm:$0xff]   ;;  %v1192_v35 = vld [vmem:[%s1490_s0 + $0x30] sm:$0xff]  }
   0xc   :  { %1120 = vmatprep.subr.bf16.mxu0 %v1181_v3  ;;  %v1209_v32 = vld [vmem:[%s1491_s3] sm:$0xff]   ;;  %v1191_v33 = vld [vmem:[%s1490_s0 + $0x28] sm:$0xff]   ;;  %v1222_v38 = vld [vmem:[%s1491_s3 + $0x98] sm:$0xff]  }
   0xd   :  { %v1211_v34 = vld [vmem:[%s1492_s1] sm:$0xff]   ;;  %v1212_v37 = vld [vmem:[%s1489_s2 + $0x8] sm:$0xff]   ;;  %v1223_v39 = vld [vmem:[%s1491_s3 + $0x90] sm:$0xff]  }
   0xe   :  { %1039 = vmatpush3.bf16.msra.mxu1 %v1199_v14  ;;  %v1219_v36 = vld [vmem:[%s1491_s3 + $0xa0] sm:$0xff]   ;;  %v1193_v40 = vld [vmem:[%s1490_s0 + $0x38] sm:$0xff]   ;;  %v1213_v41 = vld [vmem:[%s1492_s1 + $0x8] sm:$0xff]  }
   0xf   :  { %1121 = vmatpush3.bf16.msra.mxu0 %v1181_v3  ;;  %1040 = vmatprep.subr.bf16.mxu1 %v1200_v15  ;;  %v1216_v42 = vld [vmem:[%s1489_s2 + $0x10] sm:$0xff]   ;;  %v1220_v44 = vld [vmem:[%s1489_s2 + $0x18] sm:$0xff]   ;;  %v1224_v46 = vld [vmem:[%s1489_s2 + $0x20] sm:$0xff]  }
  0x10   :  { %1122 = vmatprep.subr.bf16.mxu0 %v1182_v5  ;;  %v1217_v43 = vld [vmem:[%s1492_s1 + $0x10] sm:$0xff]   ;;  %v1221_v45 = vld [vmem:[%s1492_s1 + $0x18] sm:$0xff]   ;;  %v1225_v47 = vld [vmem:[%s1492_s1 + $0x20] sm:$0xff]  }
  0x11   :  { %v1226_v48 = vld [vmem:[%s1491_s3 + $0x88] sm:$0xff]   ;;  %v1227_v49 = vld [vmem:[%s1491_s3 + $0x80] sm:$0xff]   ;;  %v1230_v52 = vld [vmem:[%s1489_s2 + $0x30] sm:$0xff]  }
  0x12   :  { %1041 = vmatpush3.bf16.msra.mxu1 %v1201_v16  ;;  %v1228_v50 = vld [vmem:[%s1489_s2 + $0x28] sm:$0xff]   ;;  %v1231_v53 = vld [vmem:[%s1492_s1 + $0x30] sm:$0xff]   ;;  %v1232_v54 = vld [vmem:[%s1489_s2 + $0x38] sm:$0xff]  }
  0x13   :  { %1123 = vmatpush3.bf16.msra.mxu0 %v1182_v5  ;;  %1042 = vmatprep.subr.bf16.mxu1 %v1202_v18  ;;  %v1229_v51 = vld [vmem:[%s1492_s1 + $0x28] sm:$0xff]   ;;  %v1233_v55 = vld [vmem:[%s1492_s1 + $0x38] sm:$0xff]  }
  0x14   :  { %1124 = vmatprep.subr.bf16.mxu0 %v1183_v6 }
  0x16   :  { %1043 = vmatpush3.bf16.msra.mxu1 %v1203_v20 }
  0x17   :  { %1125 = vmatpush3.bf16.msra.mxu0 %v1183_v6  ;;  %1044 = vmatprep.subr.bf16.mxu1 %v1204_v21 }
  0x18   :  { %1126 = vmatprep.subr.bf16.mxu0 %v1184_v9 }
  0x1a   :  { %1045 = vmatpush3.bf16.msra.mxu1 %v1205_v23 }
  0x1b   :  { %1127 = vmatpush3.bf16.msra.mxu0 %v1184_v9  ;;  %1046 = vmatprep.subr.bf16.mxu1 %v1206_v24 }
  0x1c   :  { %1128 = vmatprep.subr.bf16.mxu0 %v1185_v13 }
  0x1e   :  { %1047 = vmatpush3.bf16.msra.mxu1 %v1207_v29 }
  0x1f   :  { %1129 = vmatpush3.bf16.msra.mxu0 %v1185_v13  ;;  %1048 = vmatprep.subr.bf16.mxu1 %v1208_v30 }
  0x20   :  { %1146 = vmatprep.subr.bf16.mxu0 %v1214_v26 }
  0x22   :  { %1131 = vmatmul.mubr.bf16.vlgmr.msra.gmra.mxu0 %v1187_v17  ;;  %1049 = vmatpush3.bf16.msra.mxu1 %v1209_v32 }
  0x23   :  { %1134 = vmatprep.mubr.bf16.mxu0 %v1188_v19  ;;  %1147 = vmatpush3.bf16.msra.mxu0 %v1214_v26 }
  0x24   :  { %1148 = vmatprep.subr.bf16.mxu0 %v1215_v27 }
  0x25   :  { %619 = vmatmul.mubr.bf16.vlgmr.msra.gmra.mxu1 %v1211_v34 }
  0x26   :  { %626 = vmatprep.mubr.bf16.mxu1 %v1212_v37 }
  0x27   :  { %1149 = vmatpush3.bf16.msra.mxu0 %v1215_v27 }
  0x28   :  { %1150 = vmatprep.subr.bf16.mxu0 %v1218_v31 }
  0x2a   :  { %1135 = vmatmul.mubr.bf16.gmra.mxu0 %v1189_v25 }
  0x2b   :  { %1138 = vmatprep.mubr.bf16.mxu0 %v1190_v28  ;;  %1151 = vmatpush3.bf16.msra.mxu0 %v1218_v31 }
  0x2c   :  { %1152 = vmatprep.subr.bf16.mxu0 %v1219_v36 }
  0x2d   :  { %627 = vmatmul.mubr.bf16.gmra.mxu1 %v1213_v41 }
  0x2e   :  { %634 = vmatprep.mubr.bf16.mxu1 %v1216_v42 }
  0x2f   :  { %1153 = vmatpush3.bf16.msra.mxu0 %v1219_v36 }
  0x30   :  { %1154 = vmatprep.subr.bf16.mxu0 %v1222_v38 }
  0x32   :  { %1139 = vmatmul.mubr.bf16.gmra.mxu0 %v1191_v33 }
  0x33   :  { %1142 = vmatprep.mubr.bf16.mxu0 %v1192_v35  ;;  %1155 = vmatpush3.bf16.msra.mxu0 %v1222_v38 }
  0x34   :  { %1156 = vmatprep.subr.bf16.mxu0 %v1223_v39 }
  0x35   :  { %635 = vmatmul.mubr.bf16.gmra.mxu1 %v1217_v43 }
  0x36   :  { %642 = vmatprep.mubr.bf16.mxu1 %v1220_v44 }
  0x37   :  { %1157 = vmatpush3.bf16.msra.mxu0 %v1223_v39 }
  0x38   :  { %1158 = vmatprep.subr.bf16.mxu0 %v1226_v48 }
  0x3a   :  { %1143 = vmatmul.mubr.bf16.gmra.mxu0 %v1193_v40 }
  0x3b   :  { %1159 = vmatpush3.bf16.msra.mxu0 %v1226_v48 }
  0x3c   :  { %1160 = vmatprep.subr.bf16.mxu0 %v1227_v49 }
  0x3d   :  { %643 = vmatmul.mubr.bf16.gmra.mxu1 %v1221_v45 }
  0x3e   :  { %650 = vmatprep.mubr.bf16.mxu1 %v1224_v46  ;;  %v1441_v46 = vld [vmem:[%s1493_s4] ss:$0 sm:$0xff] }
  0x3f   :  { %1161 = vmatpush3.bf16.msra.mxu0 %v1227_v49 }
  0x45   :  { %651 = vmatmul.mubr.bf16.gmra.mxu1 %v1225_v47 }
  0x46   :  { %658 = vmatprep.mubr.bf16.mxu1 %v1228_v50 }
  0x4d   :  { %659 = vmatmul.mubr.bf16.gmra.mxu1 %v1229_v51 }
  0x4e   :  { %666 = vmatprep.mubr.bf16.mxu1 %v1230_v52 }
  0x55   :  { %667 = vmatmul.mubr.bf16.gmra.mxu1 %v1231_v53 }
  0x56   :  { %674 = vmatprep.mubr.bf16.mxu1 %v1232_v54 }
  0x5d   :  { %675 = vmatmul.mubr.bf16.gmra.mxu1 %v1233_v55 }
  0xe2   :  { %v1132_v56 = vpop.f32.mrf.mxu0 }
  0xe4   :  { %v183_v57 = vpop.f32.mrf.mxu0 }
  0xe5   :  { %v1050_v16 = vpop.f32.mrf.mxu1 }
  0xe6   :  { %v1133_v58 = vpop.f32.mrf.mxu0 }
  0xe7   :  { %v247_v61 = vpack.c.bf16 %v1133_v58, %v1132_v56  ;;  %v1051_v17 = vpop.f32.mrf.mxu1 }
  0xe8   :  { %v186_v59 = vpop.f32.mrf.mxu0  ;;  %v1052_v43 = vadd.f32 %v1051_v17, %v1050_v16 }
  0xe9   :  { %v246_v60 = vpack.c.bf16 %v186_v59, %v183_v57  ;;  %v1053_v18 = vpop.f32.mrf.mxu1 }
  0xea   :  { %v1136_v62 = vpop.f32.mrf.mxu0  ;;  %v621_v52 = vadd.f32 %v1052_v43, %v1441_v46 }
  0xeb   :  { %1162 = vmatprep.mubr.bf16.mxu0 %v246_v60  ;;  %v1054_v19 = vpop.f32.mrf.mxu1 }
  0xec   :  { %v199_v63 = vpop.f32.mrf.mxu0  ;;  %1163 = vmatmul.mubr.bf16.vlgmr.msra.gmra.mxu0 %v247_v61  ;;  %v1055_v48 = vadd.f32 %v1054_v19, %v1053_v18 }
  0xed   :  { %v1056_v20 = vpop.f32.mrf.mxu1 }
  0xee   :  { %v1137_v0 = vpop.f32.mrf.mxu0  ;;  %v624_v59 = vadd.f32 %v1055_v48, %v1441_v46 }
  0xef   :  { %v249_v3 = vpack.c.bf16 %v1137_v0, %v1136_v62  ;;  %v1057_v21 = vpop.f32.mrf.mxu1 }
  0xf0   :  { %v202_v1 = vpop.f32.mrf.mxu0  ;;  %v1058_v42 = vadd.f32 %v1057_v21, %v1056_v20 }
  0xf1   :  { %v248_v2 = vpack.c.bf16 %v202_v1, %v199_v63  ;;  %v1059_v22 = vpop.f32.mrf.mxu1 }
  0xf2   :  { %v1140_v4 = vpop.f32.mrf.mxu0  ;;  %v629_v49 = vadd.f32 %v1058_v42, %v1441_v46 }
  0xf3   :  { %1166 = vmatprep.mubr.bf16.mxu0 %v248_v2  ;;  %v1060_v23 = vpop.f32.mrf.mxu1 }
  0xf4   :  { %v215_v5 = vpop.f32.mrf.mxu0  ;;  %1167 = vmatmul.mubr.bf16.gmra.mxu0 %v249_v3  ;;  %v1061_v44 = vadd.f32 %v1060_v23, %v1059_v22 }
  0xf5   :  { %v1062_v24 = vpop.f32.mrf.mxu1 }
  0xf6   :  { %v1141_v6 = vpop.f32.mrf.mxu0  ;;  %v632_v53 = vadd.f32 %v1061_v44, %v1441_v46 }
  0xf7   :  { %v251_v9 = vpack.c.bf16 %v1141_v6, %v1140_v4  ;;  %v1063_v25 = vpop.f32.mrf.mxu1 }
  0xf8   :  { %v218_v7 = vpop.f32.mrf.mxu0  ;;  %v1064_v60 = vadd.f32 %v1063_v25, %v1062_v24 }
  0xf9   :  { %v250_v8 = vpack.c.bf16 %v218_v7, %v215_v5  ;;  %v1065_v26 = vpop.f32.mrf.mxu1 }
  0xfa   :  { %v1144_v10 = vpop.f32.mrf.mxu0 }
  0xfb   :  { %1170 = vmatprep.mubr.bf16.mxu0 %v250_v8  ;;  %v1066_v27 = vpop.f32.mrf.mxu1 }
  0xfc   :  { %v231_v11 = vpop.f32.mrf.mxu0  ;;  %1171 = vmatmul.mubr.bf16.gmra.mxu0 %v251_v9  ;;  %v1067_v3 = vadd.f32 %v1066_v27, %v1065_v26 }
  0xfd   :  { %v1068_v28 = vpop.f32.mrf.mxu1 }
  0xfe   :  { %v1145_v12 = vpop.f32.mrf.mxu0  ;;  %v640_v19 = vadd.f32 %v1067_v3, %v1441_v46 }
  0xff   :  { %v253_v15 = vpack.c.bf16 %v1145_v12, %v1144_v10  ;;  %v1069_v29 = vpop.f32.mrf.mxu1  ;;  %v637_v12 = vadd.f32 %v1064_v60, %v1441_v46 }
 0x100   :  { %v234_v13 = vpop.f32.mrf.mxu0  ;;  %v1070_v56 = vadd.f32 %v1069_v29, %v1068_v28 }
 0x101   :  { %v252_v14 = vpack.c.bf16 %v234_v13, %v231_v11  ;;  %v1071_v30 = vpop.f32.mrf.mxu1 }
 0x102   :  { %v645_v8 = vadd.f32 %v1070_v56, %v1441_v46 }
 0x103   :  { %1174 = vmatprep.mubr.bf16.mxu0 %v252_v14  ;;  %v1072_v31 = vpop.f32.mrf.mxu1 }
 0x104   :  { %1175 = vmatmul.mubr.bf16.gmra.mxu0 %v253_v15  ;;  %v1073_v62 = vadd.f32 %v1072_v31, %v1071_v30 }
 0x105   :  { %v1074_v32 = vpop.f32.mrf.mxu1 }
 0x106   :  { %v648_v13 = vadd.f32 %v1073_v62, %v1441_v46 }
 0x107   :  { %v1075_v33 = vpop.f32.mrf.mxu1 }
 0x108   :  { %v1076_v20 = vadd.f32 %v1075_v33, %v1074_v32 }
 0x109   :  { %v1077_v34 = vpop.f32.mrf.mxu1 }
 0x10b   :  { %v1078_v35 = vpop.f32.mrf.mxu1 }
 0x10c   :  { %v1079_v27 = vadd.f32 %v1078_v35, %v1077_v34 }
 0x10d   :  { %v1080_v36 = vpop.f32.mrf.mxu1 }
 0x10f   :  { %v1081_v37 = vpop.f32.mrf.mxu1 }
 0x110   :  { %v1082_v16 = vadd.f32 %v1081_v37, %v1080_v36  ;;  %v653_v37 = vadd.f32 %v1076_v20, %v1441_v46 }
 0x111   :  { %v1083_v38 = vpop.f32.mrf.mxu1 }
 0x112   :  { %v661_v36 = vadd.f32 %v1082_v16, %v1441_v46 }
 0x113   :  { %v1084_v39 = vpop.f32.mrf.mxu1 }
 0x114   :  { %v1085_v22 = vadd.f32 %v1084_v39, %v1083_v38 }
 0x115   :  { %v1432_v40 = vpop.f32.mrf.mxu1 }
 0x116   :  { %v664_v43 = vadd.f32 %v1085_v22, %v1441_v46 }
 0x117   :  { %v1434_v41 = vpop.f32.mrf.mxu1 }
 0x118   :  { %v1088_v48 = vadd.f32 %v1434_v41, %v1432_v40 }
 0x119   :  { %v1436_v45 = vpop.f32.mrf.mxu1 }
 0x11a   :  { %v669_v62 = vadd.f32 %v1088_v48, %v1441_v46 }
 0x11b   :  { %v1446_v54 = vpop.f32.mrf.mxu1 }
 0x11d   :  { %v1092_v2 = vpop.f32.mrf.mxu1 }
 0x11f   :  { %v1093_v14 = vpop.f32.mrf.mxu1 }
 0x120   :  { %v1094_v33 = vadd.f32 %v1093_v14, %v1092_v2 }
 0x121   :  { %v1095_v26 = vpop.f32.mrf.mxu1 }
 0x123   :  { %v1096_v39 = vpop.f32.mrf.mxu1 }
 0x1ac   :  { %v1164_v47 = vpop.f32.mrf.mxu0 }
 0x1ad   :  { %v726_v51 = vadd.f32 %v1164_v47, %v629_v49  ;;  %v656_v47 = vadd.f32 %v1079_v27, %v1441_v46  ;;  %v1097_v49 = vadd.f32 %v1096_v39, %v1095_v26 }
 0x1ae   :  { %v717_v50 = vpop.f32.mrf.mxu0 }
 0x1af   :  { %v718_v57 = vadd.f32 %v717_v50, %v621_v52  ;;  %v782_v63 = vmax.f32 %v726_v51, 0.0 }
 0x1b0   :  { %v1165_v55 = vpop.f32.mrf.mxu0 }
 0x1b1   :  { %v729_v58 = vadd.f32 %v1165_v55, %v632_v53  ;;  %v780_v5 = vmax.f32 %v718_v57, 0.0  ;;  %v677_v55 = vadd.f32 %v1094_v33, %v1441_v46  ;;  %v1091_v57 = vadd.f32 %v1446_v54, %v1436_v45 }
 0x1b2   :  { %v720_v61 = vpop.f32.mrf.mxu0 }
 0x1b3   :  { %v783_v0 = vmax.f32 %v729_v58, 0.0  ;;  %v721_v1 = vadd.f32 %v720_v61, %v624_v59 }
 0x1b4   :  { %v1168_v4 = vpop.f32.mrf.mxu0 }
 0x1b5   :  { %v979_v6 = vpack.c.bf16 %v783_v0, %v782_v63  ;;  %v781_v7 = vmax.f32 %v721_v1, 0.0  ;;  %v742_v11 = vadd.f32 %v1168_v4, %v645_v8  ;;  %v680_v63 = vadd.f32 %v1097_v49, %v1441_v46 }
 0x1b6   :  { %v733_v9 = vpop.f32.mrf.mxu0  ;;  %v672_v1 = vadd.f32 %v1091_v57, %v1441_v46 }
 0x1b7   :  { %1011 = vst [vmem:[%s1494_s5 + $0x8] sm:$0xff] %v979_v6   ;;  %v974_v10 = vpack.c.bf16 %v781_v7, %v780_v5  ;;  %v734_v17 = vadd.f32 %v733_v9, %v637_v12  ;;  %v786_v23 = vmax.f32 %v742_v11, 0.0 }
 0x1b8   :  { %v1169_v15 = vpop.f32.mrf.mxu0 }
 0x1b9   :  { %975 = vst [vmem:[%s1494_s5] sm:$0xff] %v974_v10   ;;  %v745_v18 = vadd.f32 %v1169_v15, %v648_v13  ;;  %v784_v29 = vmax.f32 %v734_v17, 0.0 }
 0x1ba   :  { %v736_v21 = vpop.f32.mrf.mxu0 }
 0x1bb   :  { %v787_v24 = vmax.f32 %v745_v18, 0.0  ;;  %v737_v25 = vadd.f32 %v736_v21, %v640_v19 }
 0x1bc   :  { %v1172_v28 = vpop.f32.mrf.mxu0 }
 0x1bd   :  { %v989_v30 = vpack.c.bf16 %v787_v24, %v786_v23  ;;  %v785_v31 = vmax.f32 %v737_v25, 0.0  ;;  %v758_v38 = vadd.f32 %v1172_v28, %v661_v36 }
 0x1be   :  { %v749_v42 = vpop.f32.mrf.mxu0 }
 0x1bf   :  { %1013 = vst [vmem:[%s1494_s5 + $0x18] sm:$0xff] %v989_v30   ;;  %v984_v32 = vpack.c.bf16 %v785_v31, %v784_v29  ;;  %v750_v35 = vadd.f32 %v749_v42, %v653_v37  ;;  %v790_v51 = vmax.f32 %v758_v38, 0.0 }
 0x1c0   :  { %v1173_v34 = vpop.f32.mrf.mxu0 }
 0x1c1   :  { %1012 = vst [vmem:[%s1494_s5 + $0x10] sm:$0xff] %v984_v32   ;;  %v761_v44 = vadd.f32 %v1173_v34, %v664_v43  ;;  %v788_v58 = vmax.f32 %v750_v35, 0.0 }
 0x1c2   :  { %v752_v50 = vpop.f32.mrf.mxu0 }
 0x1c3   :  { %v791_v52 = vmax.f32 %v761_v44, 0.0  ;;  %v753_v53 = vadd.f32 %v752_v50, %v656_v47 }
 0x1c4   :  { %v1176_v56 = vpop.f32.mrf.mxu0 }
 0x1c5   :  { %v999_v59 = vpack.c.bf16 %v791_v52, %v790_v51  ;;  %v789_v60 = vmax.f32 %v753_v53, 0.0  ;;  %v774_v41 = vadd.f32 %v1176_v56, %v677_v55 }
 0x1c6   :  { %v765_v61 = vpop.f32.mrf.mxu0 }
 0x1c7   :  { %1015 = vst [vmem:[%s1494_s5 + $0x28] sm:$0xff] %v999_v59   ;;  %v994_v40 = vpack.c.bf16 %v789_v60, %v788_v58  ;;  %v766_v45 = vadd.f32 %v765_v61, %v669_v62  ;;  %v794_v3 = vmax.f32 %v774_v41, 0.0 }
 0x1c8   :  { %v1177_v0 = vpop.f32.mrf.mxu0 }
 0x1c9   :  { %1014 = vst [vmem:[%s1494_s5 + $0x20] sm:$0xff] %v994_v40   ;;  %v777_v54 = vadd.f32 %v1177_v0, %v680_v63  ;;  %v792_v6 = vmax.f32 %v766_v45, 0.0 }
 0x1ca   :  { %v768_v2 = vpop.f32.mrf.mxu0 }
 0x1cb   :  { %v795_v4 = vmax.f32 %v777_v54, 0.0  ;;  %v769_v5 = vadd.f32 %v768_v2, %v672_v1 }
 0x1cd   :  { %v1009_v7 = vpack.c.bf16 %v795_v4, %v794_v3  ;;  %v793_v8 = vmax.f32 %v769_v5, 0.0 }
 0x1cf   :  { %1017 = vst [vmem:[%s1494_s5 + $0x38] sm:$0xff] %v1009_v7   ;;  %v1004_v9 = vpack.c.bf16 %v793_v8, %v792_v6 }
 0x1d1   :  { %1016 = vst [vmem:[%s1494_s5 + $0x30] sm:$0xff] %v1004_v9  }

// kernel: tagcn_forward.7
= control target key start
LH: loop header
LB: loop body
LE: loop exit
PB: predicated region body
PF: predicated region fallthrough
CT: control target
= control target key end

     0   :  { %10 = vsyncpa [#allocation3], 0  ;;  %s1274_s18 = smov [#allocation2]   ;;  %s1463_s0 = inlined_call_operand.vmem [shape: bf16[128,128], index: 0, kind: input, shape index: {}]   ;;  %s1464_s1 = inlined_call_operand.vmem [shape: bf16[128,128], index: 1, kind: input, shape index: {}]   ;;  %s1465_s2 = inlined_call_operand.vmem [shape: bf16[128,128], index: 2, kind: input, shape index: {}]   ;;  %s1466_s3 = inlined_call_operand.hbm [shape: bf16[384,128], index: 3, kind: input, shape index: {}]   ;;  %s1467_s4 = inlined_call_operand.vmem [shape: f32[1,128], index: 4, kind: input, shape index: {}]   ;;  %s1468_s5 = inlined_call_operand.vmem [shape: bf16[128,128], index: 5, kind: output, shape index: {}]  }
   0x1   :  { %s22_s19 = sshll.u32 %s1274_s18, 4  ;;  %s23_s19 = int_to_ptr.vmem [resolvable:$true] %s22_s19 }
   0x2   :  { %s1260_s20 = scalar_lea.vmem %s23_s19, 3072  ;;  %p1265_p1 = scmp.lt.s32.totalorder %s23_s19, %s23_s19 }
   0x3   :  { %p1261_p0 = scmp.ne.s32.totalorder %s23_s19, %s1260_s20  ;;  %p1266_p2 = scmp.lt.s32.totalorder %s1260_s20, %s1260_s20 }
   0x5   :  { %p1267_p3 = por %p1266_p2, %p1265_p1 }
   0x7   :  { %p1268_p4 = pnand %p1267_p3, %p1261_p0 }
   0x9   :  { %1271 = shalt.err (!%p1268_p4)
}
   0xa   :  { %s1275_s21 = smov 64   ;;  %s1276_s22 = smov 4  }
   0xb   :  { %28 = dma.hbm_to_vmem [thread:$0]  %s1466_s3, 3072, %s23_s19, [#allocation3], %s1275_s21, %s1275_s21, %s1276_s22  }
   0xc   :  { %1272 = dma.done.wait [#allocation3], 3072  }
   0xd   :  { %1273 = vsyncadd [#allocation3], 4294964224  ;;  %v1196_v0 = vld [vmem:[%s1465_s2 + $0x38] sm:$0xff]   ;;  %v1197_v1 = vld [vmem:[%s1465_s2 + $0x30] sm:$0xff]  }
   0xe   :  { %1129 = vmatprep.subr.bf16.mxu0 %v1196_v0  ;;  %v1198_v2 = vld [vmem:[%s1465_s2 + $0x28] sm:$0xff]   ;;  %v1199_v3 = vld [vmem:[%s1465_s2 + $0x20] sm:$0xff]   ;;  %v1200_v5 = vld [vmem:[%s1465_s2 + $0x18] sm:$0xff]  }
   0xf   :  { %1130 = vmatpush3.bf16.msra.mxu0 %v1196_v0  ;;  %v1204_v4 = vld [vmem:[%s1463_s0] sm:$0xff]   ;;  %v1201_v6 = vld [vmem:[%s1465_s2 + $0x10] sm:$0xff]   ;;  %v1212_v7 = vld [vmem:[#allocation2 + $0x78] sm:$0xff]  }
  0x10   :  { %1131 = vmatprep.subr.bf16.mxu0 %v1197_v1  ;;  %1145 = vmatprep.mubr.bf16.mxu0 %v1204_v4  ;;  %v1213_v8 = vld [vmem:[#allocation2 + $0x38] sm:$0xff]   ;;  %v1202_v9 = vld [vmem:[%s1465_s2 + $0x8] sm:$0xff]   ;;  %v1214_v10 = vld [vmem:[#allocation2 + $0x70] sm:$0xff]  }
  0x11   :  { %1049 = vmatprep.subr.bf16.mxu1 %v1212_v7  ;;  %v1215_v11 = vld [vmem:[#allocation2 + $0x30] sm:$0xff]   ;;  %v1216_v12 = vld [vmem:[#allocation2 + $0x68] sm:$0xff]   ;;  %v1203_v13 = vld [vmem:[%s1465_s2] sm:$0xff]  }
  0x12   :  { %1050 = vmatpush3.bf16.msra.mxu1 %v1213_v8  ;;  %v1217_v14 = vld [vmem:[#allocation2 + $0x28] sm:$0xff]   ;;  %v1218_v15 = vld [vmem:[#allocation2 + $0x60] sm:$0xff]   ;;  %v1220_v18 = vld [vmem:[#allocation2 + $0x58] sm:$0xff]  }
  0x13   :  { %1132 = vmatpush3.bf16.msra.mxu0 %v1197_v1  ;;  %1051 = vmatprep.subr.bf16.mxu1 %v1214_v10  ;;  %v1219_v16 = vld [vmem:[#allocation2 + $0x20] sm:$0xff]   ;;  %v1205_v17 = vld [vmem:[%s1463_s0 + $0x8] sm:$0xff]   ;;  %v1206_v19 = vld [vmem:[%s1463_s0 + $0x10] sm:$0xff]  }
  0x14   :  { %1133 = vmatprep.subr.bf16.mxu0 %v1198_v2  ;;  %v1221_v20 = vld [vmem:[#allocation2 + $0x18] sm:$0xff]   ;;  %v1222_v21 = vld [vmem:[#allocation2 + $0x50] sm:$0xff]   ;;  %v1228_v22 = vld [vmem:[%s1465_s2] sm:$0xff]  }
  0x15   :  { %v1223_v23 = vld [vmem:[#allocation2 + $0x10] sm:$0xff]   ;;  %632 = vmatprep.mubr.bf16.mxu1 %v1228_v22  ;;  %v1224_v24 = vld [vmem:[#allocation2 + $0x48] sm:$0xff]   ;;  %v1207_v25 = vld [vmem:[%s1463_s0 + $0x18] sm:$0xff]  }
  0x16   :  { %1052 = vmatpush3.bf16.msra.mxu1 %v1215_v11  ;;  %v1232_v26 = vld [vmem:[#allocation2 + $0xb8] sm:$0xff]   ;;  %v1233_v27 = vld [vmem:[#allocation2 + $0xb0] sm:$0xff]   ;;  %v1208_v28 = vld [vmem:[%s1463_s0 + $0x20] sm:$0xff]  }
  0x17   :  { %1134 = vmatpush3.bf16.msra.mxu0 %v1198_v2  ;;  %1053 = vmatprep.subr.bf16.mxu1 %v1216_v12  ;;  %v1225_v29 = vld [vmem:[#allocation2 + $0x8] sm:$0xff]   ;;  %v1226_v30 = vld [vmem:[#allocation2 + $0x40] sm:$0xff]   ;;  %v1210_v35 = vld [vmem:[%s1463_s0 + $0x30] sm:$0xff]  }
  0x18   :  { %1135 = vmatprep.subr.bf16.mxu0 %v1199_v3  ;;  %v1236_v31 = vld [vmem:[#allocation2 + $0xa8] sm:$0xff]   ;;  %v1227_v32 = vld [vmem:[#allocation2] sm:$0xff]   ;;  %v1240_v38 = vld [vmem:[#allocation2 + $0x98] sm:$0xff]  }
  0x19   :  { %v1209_v33 = vld [vmem:[%s1463_s0 + $0x28] sm:$0xff]   ;;  %v1229_v34 = vld [vmem:[%s1464_s1] sm:$0xff]   ;;  %v1241_v39 = vld [vmem:[#allocation2 + $0x90] sm:$0xff]  }
  0x1a   :  { %1054 = vmatpush3.bf16.msra.mxu1 %v1217_v14  ;;  %v1237_v36 = vld [vmem:[#allocation2 + $0xa0] sm:$0xff]   ;;  %v1230_v37 = vld [vmem:[%s1465_s2 + $0x8] sm:$0xff]   ;;  %v1211_v40 = vld [vmem:[%s1463_s0 + $0x38] sm:$0xff]  }
  0x1b   :  { %1136 = vmatpush3.bf16.msra.mxu0 %v1199_v3  ;;  %1055 = vmatprep.subr.bf16.mxu1 %v1218_v15  ;;  %v1231_v41 = vld [vmem:[%s1464_s1 + $0x8] sm:$0xff]   ;;  %v1234_v42 = vld [vmem:[%s1465_s2 + $0x10] sm:$0xff]   ;;  %v1238_v44 = vld [vmem:[%s1465_s2 + $0x18] sm:$0xff]  }
  0x1c   :  { %1137 = vmatprep.subr.bf16.mxu0 %v1200_v5  ;;  %v1235_v43 = vld [vmem:[%s1464_s1 + $0x10] sm:$0xff]   ;;  %v1239_v45 = vld [vmem:[%s1464_s1 + $0x18] sm:$0xff]   ;;  %v1242_v46 = vld [vmem:[%s1465_s2 + $0x20] sm:$0xff]  }
  0x1d   :  { %v1243_v47 = vld [vmem:[%s1464_s1 + $0x20] sm:$0xff]   ;;  %v1244_v48 = vld [vmem:[#allocation2 + $0x88] sm:$0xff]   ;;  %v1248_v52 = vld [vmem:[%s1465_s2 + $0x30] sm:$0xff]  }
  0x1e   :  { %1056 = vmatpush3.bf16.msra.mxu1 %v1219_v16  ;;  %v1245_v49 = vld [vmem:[#allocation2 + $0x80] sm:$0xff]   ;;  %v1246_v50 = vld [vmem:[%s1465_s2 + $0x28] sm:$0xff]   ;;  %v1249_v53 = vld [vmem:[%s1464_s1 + $0x30] sm:$0xff]  }
  0x1f   :  { %1138 = vmatpush3.bf16.msra.mxu0 %v1200_v5  ;;  %1057 = vmatprep.subr.bf16.mxu1 %v1220_v18  ;;  %v1247_v51 = vld [vmem:[%s1464_s1 + $0x28] sm:$0xff]   ;;  %v1250_v54 = vld [vmem:[%s1465_s2 + $0x38] sm:$0xff]  }
  0x20   :  { %1139 = vmatprep.subr.bf16.mxu0 %v1201_v6  ;;  %v1251_v55 = vld [vmem:[%s1464_s1 + $0x38] sm:$0xff]  }
  0x22   :  { %1058 = vmatpush3.bf16.msra.mxu1 %v1221_v20 }
  0x23   :  { %1140 = vmatpush3.bf16.msra.mxu0 %v1201_v6  ;;  %1059 = vmatprep.subr.bf16.mxu1 %v1222_v21 }
  0x24   :  { %1141 = vmatprep.subr.bf16.mxu0 %v1202_v9 }
  0x26   :  { %1060 = vmatpush3.bf16.msra.mxu1 %v1223_v23 }
  0x27   :  { %1142 = vmatpush3.bf16.msra.mxu0 %v1202_v9  ;;  %1061 = vmatprep.subr.bf16.mxu1 %v1224_v24 }
  0x28   :  { %1143 = vmatprep.subr.bf16.mxu0 %v1203_v13 }
  0x2a   :  { %1062 = vmatpush3.bf16.msra.mxu1 %v1225_v29 }
  0x2b   :  { %1144 = vmatpush3.bf16.msra.mxu0 %v1203_v13  ;;  %1063 = vmatprep.subr.bf16.mxu1 %v1226_v30 }
  0x2c   :  { %1161 = vmatprep.subr.bf16.mxu0 %v1232_v26 }
  0x2e   :  { %1146 = vmatmul.mubr.bf16.vlgmr.msra.gmra.mxu0 %v1205_v17  ;;  %1064 = vmatpush3.bf16.msra.mxu1 %v1227_v32 }
  0x2f   :  { %1149 = vmatprep.mubr.bf16.mxu0 %v1206_v19  ;;  %1162 = vmatpush3.bf16.msra.mxu0 %v1232_v26 }
  0x30   :  { %1163 = vmatprep.subr.bf16.mxu0 %v1233_v27 }
  0x31   :  { %633 = vmatmul.mubr.bf16.vlgmr.msra.gmra.mxu1 %v1229_v34 }
  0x32   :  { %640 = vmatprep.mubr.bf16.mxu1 %v1230_v37 }
  0x33   :  { %1164 = vmatpush3.bf16.msra.mxu0 %v1233_v27 }
  0x34   :  { %1165 = vmatprep.subr.bf16.mxu0 %v1236_v31 }
  0x36   :  { %1150 = vmatmul.mubr.bf16.gmra.mxu0 %v1207_v25 }
  0x37   :  { %1153 = vmatprep.mubr.bf16.mxu0 %v1208_v28  ;;  %1166 = vmatpush3.bf16.msra.mxu0 %v1236_v31 }
  0x38   :  { %1167 = vmatprep.subr.bf16.mxu0 %v1237_v36 }
  0x39   :  { %641 = vmatmul.mubr.bf16.gmra.mxu1 %v1231_v41 }
  0x3a   :  { %648 = vmatprep.mubr.bf16.mxu1 %v1234_v42 }
  0x3b   :  { %1168 = vmatpush3.bf16.msra.mxu0 %v1237_v36 }
  0x3c   :  { %1169 = vmatprep.subr.bf16.mxu0 %v1240_v38 }
  0x3e   :  { %1154 = vmatmul.mubr.bf16.gmra.mxu0 %v1209_v33 }
  0x3f   :  { %1157 = vmatprep.mubr.bf16.mxu0 %v1210_v35  ;;  %1170 = vmatpush3.bf16.msra.mxu0 %v1240_v38 }
  0x40   :  { %1171 = vmatprep.subr.bf16.mxu0 %v1241_v39 }
  0x41   :  { %649 = vmatmul.mubr.bf16.gmra.mxu1 %v1235_v43 }
  0x42   :  { %656 = vmatprep.mubr.bf16.mxu1 %v1238_v44 }
  0x43   :  { %1172 = vmatpush3.bf16.msra.mxu0 %v1241_v39 }
  0x44   :  { %1173 = vmatprep.subr.bf16.mxu0 %v1244_v48 }
  0x46   :  { %1158 = vmatmul.mubr.bf16.gmra.mxu0 %v1211_v40 }
  0x47   :  { %1174 = vmatpush3.bf16.msra.mxu0 %v1244_v48 }
  0x48   :  { %1175 = vmatprep.subr.bf16.mxu0 %v1245_v49 }
  0x49   :  { %657 = vmatmul.mubr.bf16.gmra.mxu1 %v1239_v45 }
  0x4a   :  { %664 = vmatprep.mubr.bf16.mxu1 %v1242_v46  ;;  %v1415_v46 = vld [vmem:[%s1467_s4] ss:$0 sm:$0xff] }
  0x4b   :  { %1176 = vmatpush3.bf16.msra.mxu0 %v1245_v49 }
  0x51   :  { %665 = vmatmul.mubr.bf16.gmra.mxu1 %v1243_v47 }
  0x52   :  { %672 = vmatprep.mubr.bf16.mxu1 %v1246_v50 }
  0x59   :  { %673 = vmatmul.mubr.bf16.gmra.mxu1 %v1247_v51 }
  0x5a   :  { %680 = vmatprep.mubr.bf16.mxu1 %v1248_v52 }
  0x61   :  { %681 = vmatmul.mubr.bf16.gmra.mxu1 %v1249_v53 }
  0x62   :  { %688 = vmatprep.mubr.bf16.mxu1 %v1250_v54 }
  0x69   :  { %689 = vmatmul.mubr.bf16.gmra.mxu1 %v1251_v55 }
  0xee   :  { %v1147_v56 = vpop.f32.mrf.mxu0 }
  0xf0   :  { %v197_v57 = vpop.f32.mrf.mxu0 }
  0xf1   :  { %v1065_v16 = vpop.f32.mrf.mxu1 }
  0xf2   :  { %v1148_v58 = vpop.f32.mrf.mxu0 }
  0xf3   :  { %v261_v61 = vpack.c.bf16 %v1148_v58, %v1147_v56  ;;  %v1066_v17 = vpop.f32.mrf.mxu1 }
  0xf4   :  { %v200_v59 = vpop.f32.mrf.mxu0  ;;  %v1067_v43 = vadd.f32 %v1066_v17, %v1065_v16 }
  0xf5   :  { %v260_v60 = vpack.c.bf16 %v200_v59, %v197_v57  ;;  %v1068_v18 = vpop.f32.mrf.mxu1 }
  0xf6   :  { %v1151_v62 = vpop.f32.mrf.mxu0  ;;  %v635_v52 = vadd.f32 %v1067_v43, %v1415_v46 }
  0xf7   :  { %1177 = vmatprep.mubr.bf16.mxu0 %v260_v60  ;;  %v1069_v19 = vpop.f32.mrf.mxu1 }
  0xf8   :  { %v213_v63 = vpop.f32.mrf.mxu0  ;;  %1178 = vmatmul.mubr.bf16.vlgmr.msra.gmra.mxu0 %v261_v61  ;;  %v1070_v48 = vadd.f32 %v1069_v19, %v1068_v18 }
  0xf9   :  { %v1071_v20 = vpop.f32.mrf.mxu1 }
  0xfa   :  { %v1152_v0 = vpop.f32.mrf.mxu0  ;;  %v638_v59 = vadd.f32 %v1070_v48, %v1415_v46 }
  0xfb   :  { %v263_v3 = vpack.c.bf16 %v1152_v0, %v1151_v62  ;;  %v1072_v21 = vpop.f32.mrf.mxu1 }
  0xfc   :  { %v216_v1 = vpop.f32.mrf.mxu0  ;;  %v1073_v42 = vadd.f32 %v1072_v21, %v1071_v20 }
  0xfd   :  { %v262_v2 = vpack.c.bf16 %v216_v1, %v213_v63  ;;  %v1074_v22 = vpop.f32.mrf.mxu1 }
  0xfe   :  { %v1155_v4 = vpop.f32.mrf.mxu0  ;;  %v643_v49 = vadd.f32 %v1073_v42, %v1415_v46 }
  0xff   :  { %1181 = vmatprep.mubr.bf16.mxu0 %v262_v2  ;;  %v1075_v23 = vpop.f32.mrf.mxu1 }
 0x100   :  { %v229_v5 = vpop.f32.mrf.mxu0  ;;  %1182 = vmatmul.mubr.bf16.gmra.mxu0 %v263_v3  ;;  %v1076_v44 = vadd.f32 %v1075_v23, %v1074_v22 }
 0x101   :  { %v1077_v24 = vpop.f32.mrf.mxu1 }
 0x102   :  { %v1156_v6 = vpop.f32.mrf.mxu0  ;;  %v646_v53 = vadd.f32 %v1076_v44, %v1415_v46 }
 0x103   :  { %v265_v9 = vpack.c.bf16 %v1156_v6, %v1155_v4  ;;  %v1078_v25 = vpop.f32.mrf.mxu1 }
 0x104   :  { %v232_v7 = vpop.f32.mrf.mxu0  ;;  %v1079_v60 = vadd.f32 %v1078_v25, %v1077_v24 }
 0x105   :  { %v264_v8 = vpack.c.bf16 %v232_v7, %v229_v5  ;;  %v1080_v26 = vpop.f32.mrf.mxu1 }
 0x106   :  { %v1159_v10 = vpop.f32.mrf.mxu0 }
 0x107   :  { %1185 = vmatprep.mubr.bf16.mxu0 %v264_v8  ;;  %v1081_v27 = vpop.f32.mrf.mxu1 }
 0x108   :  { %v245_v11 = vpop.f32.mrf.mxu0  ;;  %1186 = vmatmul.mubr.bf16.gmra.mxu0 %v265_v9  ;;  %v1082_v3 = vadd.f32 %v1081_v27, %v1080_v26 }
 0x109   :  { %v1083_v28 = vpop.f32.mrf.mxu1 }
 0x10a   :  { %v1160_v12 = vpop.f32.mrf.mxu0  ;;  %v654_v19 = vadd.f32 %v1082_v3, %v1415_v46 }
 0x10b   :  { %v267_v15 = vpack.c.bf16 %v1160_v12, %v1159_v10  ;;  %v1084_v29 = vpop.f32.mrf.mxu1  ;;  %v651_v12 = vadd.f32 %v1079_v60, %v1415_v46 }
 0x10c   :  { %v248_v13 = vpop.f32.mrf.mxu0  ;;  %v1085_v56 = vadd.f32 %v1084_v29, %v1083_v28 }
 0x10d   :  { %v266_v14 = vpack.c.bf16 %v248_v13, %v245_v11  ;;  %v1086_v30 = vpop.f32.mrf.mxu1 }
 0x10e   :  { %v659_v8 = vadd.f32 %v1085_v56, %v1415_v46 }
 0x10f   :  { %1189 = vmatprep.mubr.bf16.mxu0 %v266_v14  ;;  %v1087_v31 = vpop.f32.mrf.mxu1 }
 0x110   :  { %1190 = vmatmul.mubr.bf16.gmra.mxu0 %v267_v15  ;;  %v1088_v62 = vadd.f32 %v1087_v31, %v1086_v30 }
 0x111   :  { %v1089_v32 = vpop.f32.mrf.mxu1 }
 0x112   :  { %v662_v13 = vadd.f32 %v1088_v62, %v1415_v46 }
 0x113   :  { %v1090_v33 = vpop.f32.mrf.mxu1 }
 0x114   :  { %v1091_v20 = vadd.f32 %v1090_v33, %v1089_v32 }
 0x115   :  { %v1092_v34 = vpop.f32.mrf.mxu1 }
 0x117   :  { %v1093_v35 = vpop.f32.mrf.mxu1 }
 0x118   :  { %v1094_v27 = vadd.f32 %v1093_v35, %v1092_v34 }
 0x119   :  { %v1095_v36 = vpop.f32.mrf.mxu1 }
 0x11b   :  { %v1096_v37 = vpop.f32.mrf.mxu1 }
 0x11c   :  { %v1097_v16 = vadd.f32 %v1096_v37, %v1095_v36  ;;  %v667_v37 = vadd.f32 %v1091_v20, %v1415_v46 }
 0x11d   :  { %v1098_v38 = vpop.f32.mrf.mxu1 }
 0x11e   :  { %v675_v36 = vadd.f32 %v1097_v16, %v1415_v46 }
 0x11f   :  { %v1099_v39 = vpop.f32.mrf.mxu1 }
 0x120   :  { %v1100_v22 = vadd.f32 %v1099_v39, %v1098_v38 }
 0x121   :  { %v1406_v40 = vpop.f32.mrf.mxu1 }
 0x122   :  { %v678_v43 = vadd.f32 %v1100_v22, %v1415_v46 }
 0x123   :  { %v1408_v41 = vpop.f32.mrf.mxu1 }
 0x124   :  { %v1103_v48 = vadd.f32 %v1408_v41, %v1406_v40 }
 0x125   :  { %v1410_v45 = vpop.f32.mrf.mxu1 }
 0x126   :  { %v683_v62 = vadd.f32 %v1103_v48, %v1415_v46 }
 0x127   :  { %v1420_v54 = vpop.f32.mrf.mxu1 }
 0x129   :  { %v1107_v2 = vpop.f32.mrf.mxu1 }
 0x12b   :  { %v1108_v14 = vpop.f32.mrf.mxu1 }
 0x12c   :  { %v1109_v33 = vadd.f32 %v1108_v14, %v1107_v2 }
 0x12d   :  { %v1110_v26 = vpop.f32.mrf.mxu1 }
 0x12f   :  { %v1111_v39 = vpop.f32.mrf.mxu1 }
 0x1b8   :  { %v1179_v47 = vpop.f32.mrf.mxu0 }
 0x1b9   :  { %v740_v51 = vadd.f32 %v1179_v47, %v643_v49  ;;  %v670_v47 = vadd.f32 %v1094_v27, %v1415_v46  ;;  %v1112_v49 = vadd.f32 %v1111_v39, %v1110_v26 }
 0x1ba   :  { %v731_v50 = vpop.f32.mrf.mxu0 }
 0x1bb   :  { %v732_v57 = vadd.f32 %v731_v50, %v635_v52  ;;  %v796_v63 = vmax.f32 %v740_v51, 0.0 }
 0x1bc   :  { %v1180_v55 = vpop.f32.mrf.mxu0 }
 0x1bd   :  { %v743_v58 = vadd.f32 %v1180_v55, %v646_v53  ;;  %v794_v5 = vmax.f32 %v732_v57, 0.0  ;;  %v691_v55 = vadd.f32 %v1109_v33, %v1415_v46  ;;  %v1106_v57 = vadd.f32 %v1420_v54, %v1410_v45 }
 0x1be   :  { %v734_v61 = vpop.f32.mrf.mxu0 }
 0x1bf   :  { %v797_v0 = vmax.f32 %v743_v58, 0.0  ;;  %v735_v1 = vadd.f32 %v734_v61, %v638_v59 }
 0x1c0   :  { %v1183_v4 = vpop.f32.mrf.mxu0 }
 0x1c1   :  { %v994_v6 = vpack.c.bf16 %v797_v0, %v796_v63  ;;  %v795_v7 = vmax.f32 %v735_v1, 0.0  ;;  %v756_v11 = vadd.f32 %v1183_v4, %v659_v8  ;;  %v694_v63 = vadd.f32 %v1112_v49, %v1415_v46 }
 0x1c2   :  { %v747_v9 = vpop.f32.mrf.mxu0  ;;  %v686_v1 = vadd.f32 %v1106_v57, %v1415_v46 }
 0x1c3   :  { %1026 = vst [vmem:[%s1468_s5 + $0x8] sm:$0xff] %v994_v6   ;;  %v989_v10 = vpack.c.bf16 %v795_v7, %v794_v5  ;;  %v748_v17 = vadd.f32 %v747_v9, %v651_v12  ;;  %v800_v23 = vmax.f32 %v756_v11, 0.0 }
 0x1c4   :  { %v1184_v15 = vpop.f32.mrf.mxu0 }
 0x1c5   :  { %990 = vst [vmem:[%s1468_s5] sm:$0xff] %v989_v10   ;;  %v759_v18 = vadd.f32 %v1184_v15, %v662_v13  ;;  %v798_v29 = vmax.f32 %v748_v17, 0.0 }
 0x1c6   :  { %v750_v21 = vpop.f32.mrf.mxu0 }
 0x1c7   :  { %v801_v24 = vmax.f32 %v759_v18, 0.0  ;;  %v751_v25 = vadd.f32 %v750_v21, %v654_v19 }
 0x1c8   :  { %v1187_v28 = vpop.f32.mrf.mxu0 }
 0x1c9   :  { %v1004_v30 = vpack.c.bf16 %v801_v24, %v800_v23  ;;  %v799_v31 = vmax.f32 %v751_v25, 0.0  ;;  %v772_v38 = vadd.f32 %v1187_v28, %v675_v36 }
 0x1ca   :  { %v763_v42 = vpop.f32.mrf.mxu0 }
 0x1cb   :  { %1028 = vst [vmem:[%s1468_s5 + $0x18] sm:$0xff] %v1004_v30   ;;  %v999_v32 = vpack.c.bf16 %v799_v31, %v798_v29  ;;  %v764_v35 = vadd.f32 %v763_v42, %v667_v37  ;;  %v804_v51 = vmax.f32 %v772_v38, 0.0 }
 0x1cc   :  { %v1188_v34 = vpop.f32.mrf.mxu0 }
 0x1cd   :  { %1027 = vst [vmem:[%s1468_s5 + $0x10] sm:$0xff] %v999_v32   ;;  %v775_v44 = vadd.f32 %v1188_v34, %v678_v43  ;;  %v802_v58 = vmax.f32 %v764_v35, 0.0 }
 0x1ce   :  { %v766_v50 = vpop.f32.mrf.mxu0 }
 0x1cf   :  { %v805_v52 = vmax.f32 %v775_v44, 0.0  ;;  %v767_v53 = vadd.f32 %v766_v50, %v670_v47 }
 0x1d0   :  { %v1191_v56 = vpop.f32.mrf.mxu0 }
 0x1d1   :  { %v1014_v59 = vpack.c.bf16 %v805_v52, %v804_v51  ;;  %v803_v60 = vmax.f32 %v767_v53, 0.0  ;;  %v788_v41 = vadd.f32 %v1191_v56, %v691_v55 }
 0x1d2   :  { %v779_v61 = vpop.f32.mrf.mxu0 }
 0x1d3   :  { %1030 = vst [vmem:[%s1468_s5 + $0x28] sm:$0xff] %v1014_v59   ;;  %v1009_v40 = vpack.c.bf16 %v803_v60, %v802_v58  ;;  %v780_v45 = vadd.f32 %v779_v61, %v683_v62  ;;  %v808_v3 = vmax.f32 %v788_v41, 0.0 }
 0x1d4   :  { %v1192_v0 = vpop.f32.mrf.mxu0 }
 0x1d5   :  { %1029 = vst [vmem:[%s1468_s5 + $0x20] sm:$0xff] %v1009_v40   ;;  %v791_v54 = vadd.f32 %v1192_v0, %v694_v63  ;;  %v806_v6 = vmax.f32 %v780_v45, 0.0 }
 0x1d6   :  { %v782_v2 = vpop.f32.mrf.mxu0 }
 0x1d7   :  { %v809_v4 = vmax.f32 %v791_v54, 0.0  ;;  %v783_v5 = vadd.f32 %v782_v2, %v686_v1 }
 0x1d9   :  { %v1024_v7 = vpack.c.bf16 %v809_v4, %v808_v3  ;;  %v807_v8 = vmax.f32 %v783_v5, 0.0 }
 0x1db   :  { %1032 = vst [vmem:[%s1468_s5 + $0x38] sm:$0xff] %v1024_v7   ;;  %v1019_v9 = vpack.c.bf16 %v807_v8, %v806_v6 }
 0x1dd   :  { %1031 = vst [vmem:[%s1468_s5 + $0x30] sm:$0xff] %v1019_v9  }
 0x1de   :  { %894 = vsyncpa [#allocation3], 1 }

// kernel: tagcn_forward.11
= control target key start
LH: loop header
LB: loop body
LE: loop exit
PB: predicated region body
PF: predicated region fallthrough
CT: control target
= control target key end

     0   :  { %s1344_s0 = inlined_call_operand.vmem [shape: bf16[128,128], index: 0, kind: input, shape index: {}]   ;;  %s1345_s1 = inlined_call_operand.vmem [shape: bf16[128,128], index: 1, kind: input, shape index: {}]   ;;  %s1346_s2 = inlined_call_operand.vmem [shape: bf16[128,128], index: 2, kind: input, shape index: {}]   ;;  %s1347_s3 = inlined_call_operand.vmem [shape: bf16[384,128], index: 3, kind: input, shape index: {}]   ;;  %s1348_s4 = inlined_call_operand.vmem [shape: f32[1,128], index: 4, kind: input, shape index: {}]   ;;  %s1349_s5 = inlined_call_operand.hbm [shape: f32[128,128], index: 5, kind: output, shape index: {}]  }
   0x1   :  { %v1035_v0 = vld [vmem:[%s1346_s2 + $0x38] sm:$0xff]   ;;  %v1036_v1 = vld [vmem:[%s1346_s2 + $0x30] sm:$0xff]   ;;  %v1037_v2 = vld [vmem:[%s1346_s2 + $0x28] sm:$0xff]  }
   0x2   :  { %968 = vmatprep.subr.bf16.mxu0 %v1035_v0  ;;  %v1038_v3 = vld [vmem:[%s1346_s2 + $0x20] sm:$0xff]   ;;  %v1039_v5 = vld [vmem:[%s1346_s2 + $0x18] sm:$0xff]   ;;  %v1040_v6 = vld [vmem:[%s1346_s2 + $0x10] sm:$0xff]  }
   0x3   :  { %969 = vmatpush3.bf16.msra.mxu0 %v1035_v0  ;;  %v1043_v4 = vld [vmem:[%s1344_s0] sm:$0xff]   ;;  %v1051_v7 = vld [vmem:[%s1347_s3 + $0x78] sm:$0xff]   ;;  %v1041_v9 = vld [vmem:[%s1346_s2 + $0x8] sm:$0xff]  }
   0x4   :  { %970 = vmatprep.subr.bf16.mxu0 %v1036_v1  ;;  %984 = vmatprep.mubr.bf16.mxu0 %v1043_v4  ;;  %v1052_v8 = vld [vmem:[%s1347_s3 + $0x38] sm:$0xff]   ;;  %v1053_v10 = vld [vmem:[%s1347_s3 + $0x70] sm:$0xff]   ;;  %v1055_v12 = vld [vmem:[%s1347_s3 + $0x68] sm:$0xff]  }
   0x5   :  { %888 = vmatprep.subr.bf16.mxu1 %v1051_v7  ;;  %v1054_v11 = vld [vmem:[%s1347_s3 + $0x30] sm:$0xff]   ;;  %v1042_v13 = vld [vmem:[%s1346_s2] sm:$0xff]   ;;  %v1056_v14 = vld [vmem:[%s1347_s3 + $0x28] sm:$0xff]  }
   0x6   :  { %889 = vmatpush3.bf16.msra.mxu1 %v1052_v8  ;;  %v1057_v15 = vld [vmem:[%s1347_s3 + $0x60] sm:$0xff]   ;;  %v1044_v17 = vld [vmem:[%s1344_s0 + $0x8] sm:$0xff]   ;;  %v1059_v18 = vld [vmem:[%s1347_s3 + $0x58] sm:$0xff]  }
   0x7   :  { %971 = vmatpush3.bf16.msra.mxu0 %v1036_v1  ;;  %890 = vmatprep.subr.bf16.mxu1 %v1053_v10  ;;  %v1058_v16 = vld [vmem:[%s1347_s3 + $0x20] sm:$0xff]   ;;  %v1045_v19 = vld [vmem:[%s1344_s0 + $0x10] sm:$0xff]   ;;  %v1060_v20 = vld [vmem:[%s1347_s3 + $0x18] sm:$0xff]  }
   0x8   :  { %972 = vmatprep.subr.bf16.mxu0 %v1037_v2  ;;  %v1061_v21 = vld [vmem:[%s1347_s3 + $0x50] sm:$0xff]   ;;  %v1067_v22 = vld [vmem:[%s1346_s2] sm:$0xff]   ;;  %v1063_v24 = vld [vmem:[%s1347_s3 + $0x48] sm:$0xff]  }
   0x9   :  { %v1062_v23 = vld [vmem:[%s1347_s3 + $0x10] sm:$0xff]   ;;  %619 = vmatprep.mubr.bf16.mxu1 %v1067_v22  ;;  %v1046_v25 = vld [vmem:[%s1344_s0 + $0x18] sm:$0xff]   ;;  %v1047_v28 = vld [vmem:[%s1344_s0 + $0x20] sm:$0xff]  }
   0xa   :  { %891 = vmatpush3.bf16.msra.mxu1 %v1054_v11  ;;  %v1071_v26 = vld [vmem:[%s1347_s3 + $0xb8] sm:$0xff]   ;;  %v1072_v27 = vld [vmem:[%s1347_s3 + $0xb0] sm:$0xff]   ;;  %v1064_v29 = vld [vmem:[%s1347_s3 + $0x8] sm:$0xff]  }
   0xb   :  { %973 = vmatpush3.bf16.msra.mxu0 %v1037_v2  ;;  %892 = vmatprep.subr.bf16.mxu1 %v1055_v12  ;;  %v1065_v30 = vld [vmem:[%s1347_s3 + $0x40] sm:$0xff]   ;;  %v1075_v31 = vld [vmem:[%s1347_s3 + $0xa8] sm:$0xff]   ;;  %v1049_v35 = vld [vmem:[%s1344_s0 + $0x30] sm:$0xff]  }
   0xc   :  { %974 = vmatprep.subr.bf16.mxu0 %v1038_v3  ;;  %v1066_v32 = vld [vmem:[%s1347_s3] sm:$0xff]   ;;  %v1048_v33 = vld [vmem:[%s1344_s0 + $0x28] sm:$0xff]   ;;  %v1079_v38 = vld [vmem:[%s1347_s3 + $0x98] sm:$0xff]  }
   0xd   :  { %v1068_v34 = vld [vmem:[%s1345_s1] sm:$0xff]   ;;  %v1069_v37 = vld [vmem:[%s1346_s2 + $0x8] sm:$0xff]   ;;  %v1080_v39 = vld [vmem:[%s1347_s3 + $0x90] sm:$0xff]  }
   0xe   :  { %893 = vmatpush3.bf16.msra.mxu1 %v1056_v14  ;;  %v1076_v36 = vld [vmem:[%s1347_s3 + $0xa0] sm:$0xff]  }
   0xf   :  { %975 = vmatpush3.bf16.msra.mxu0 %v1038_v3  ;;  %894 = vmatprep.subr.bf16.mxu1 %v1057_v15 }
  0x10   :  { %976 = vmatprep.subr.bf16.mxu0 %v1039_v5 }
  0x12   :  { %895 = vmatpush3.bf16.msra.mxu1 %v1058_v16 }
  0x13   :  { %977 = vmatpush3.bf16.msra.mxu0 %v1039_v5  ;;  %896 = vmatprep.subr.bf16.mxu1 %v1059_v18 }
  0x14   :  { %978 = vmatprep.subr.bf16.mxu0 %v1040_v6 }
  0x16   :  { %897 = vmatpush3.bf16.msra.mxu1 %v1060_v20 }
  0x17   :  { %979 = vmatpush3.bf16.msra.mxu0 %v1040_v6  ;;  %898 = vmatprep.subr.bf16.mxu1 %v1061_v21 }
  0x18   :  { %980 = vmatprep.subr.bf16.mxu0 %v1041_v9 }
  0x1a   :  { %899 = vmatpush3.bf16.msra.mxu1 %v1062_v23 }
  0x1b   :  { %981 = vmatpush3.bf16.msra.mxu0 %v1041_v9  ;;  %900 = vmatprep.subr.bf16.mxu1 %v1063_v24 }
  0x1c   :  { %982 = vmatprep.subr.bf16.mxu0 %v1042_v13 }
  0x1e   :  { %901 = vmatpush3.bf16.msra.mxu1 %v1064_v29 }
  0x1f   :  { %983 = vmatpush3.bf16.msra.mxu0 %v1042_v13  ;;  %902 = vmatprep.subr.bf16.mxu1 %v1065_v30 }
  0x20   :  { %1000 = vmatprep.subr.bf16.mxu0 %v1071_v26 }
  0x22   :  { %985 = vmatmul.mubr.bf16.vlgmr.msra.gmra.mxu0 %v1044_v17  ;;  %903 = vmatpush3.bf16.msra.mxu1 %v1066_v32 }
  0x23   :  { %988 = vmatprep.mubr.bf16.mxu0 %v1045_v19  ;;  %1001 = vmatpush3.bf16.msra.mxu0 %v1071_v26 }
  0x24   :  { %1002 = vmatprep.subr.bf16.mxu0 %v1072_v27 }
  0x25   :  { %620 = vmatmul.mubr.bf16.vlgmr.msra.gmra.mxu1 %v1068_v34 }
  0x26   :  { %627 = vmatprep.mubr.bf16.mxu1 %v1069_v37 }
  0x27   :  { %1003 = vmatpush3.bf16.msra.mxu0 %v1072_v27 }
  0x28   :  { %1004 = vmatprep.subr.bf16.mxu0 %v1075_v31 }
  0x2a   :  { %989 = vmatmul.mubr.bf16.gmra.mxu0 %v1046_v25 }
  0x2b   :  { %992 = vmatprep.mubr.bf16.mxu0 %v1047_v28  ;;  %1005 = vmatpush3.bf16.msra.mxu0 %v1075_v31 }
  0x2c   :  { %1006 = vmatprep.subr.bf16.mxu0 %v1076_v36 }
  0x2f   :  { %1007 = vmatpush3.bf16.msra.mxu0 %v1076_v36 }
  0x30   :  { %1008 = vmatprep.subr.bf16.mxu0 %v1079_v38 }
  0x32   :  { %993 = vmatmul.mubr.bf16.gmra.mxu0 %v1048_v33 }
  0x33   :  { %996 = vmatprep.mubr.bf16.mxu0 %v1049_v35 }
  0x34   :  { %10 = vsyncpa [#allocation3], 0  ;;  %v1050_v40 = vld [vmem:[%s1344_s0 + $0x38] sm:$0xff]   ;;  %v1070_v41 = vld [vmem:[%s1345_s1 + $0x8] sm:$0xff]   ;;  %1009 = vmatpush3.bf16.msra.mxu0 %v1079_v38 }
  0x35   :  { %v1073_v42 = vld [vmem:[%s1346_s2 + $0x10] sm:$0xff]   ;;  %1010 = vmatprep.subr.bf16.mxu0 %v1080_v39  ;;  %628 = vmatmul.mubr.bf16.gmra.mxu1 %v1070_v41  ;;  %v1077_v44 = vld [vmem:[%s1346_s2 + $0x18] sm:$0xff]   ;;  %v1081_v46 = vld [vmem:[%s1346_s2 + $0x20] sm:$0xff]  }
  0x36   :  { %635 = vmatprep.mubr.bf16.mxu1 %v1073_v42  ;;  %v1074_v43 = vld [vmem:[%s1345_s1 + $0x10] sm:$0xff]   ;;  %v1078_v45 = vld [vmem:[%s1345_s1 + $0x18] sm:$0xff]   ;;  %v1082_v47 = vld [vmem:[%s1345_s1 + $0x20] sm:$0xff]  }
  0x37   :  { %v1083_v48 = vld [vmem:[%s1347_s3 + $0x88] sm:$0xff]   ;;  %v1084_v49 = vld [vmem:[%s1347_s3 + $0x80] sm:$0xff]   ;;  %v1087_v52 = vld [vmem:[%s1346_s2 + $0x30] sm:$0xff]  }
  0x38   :  { %1011 = vmatpush3.bf16.msra.mxu0 %v1080_v39  ;;  %v1085_v50 = vld [vmem:[%s1346_s2 + $0x28] sm:$0xff]   ;;  %v1088_v53 = vld [vmem:[%s1345_s1 + $0x30] sm:$0xff]   ;;  %v1089_v54 = vld [vmem:[%s1346_s2 + $0x38] sm:$0xff]  }
  0x39   :  { %1012 = vmatprep.subr.bf16.mxu0 %v1083_v48  ;;  %v1086_v51 = vld [vmem:[%s1345_s1 + $0x28] sm:$0xff]   ;;  %v1090_v55 = vld [vmem:[%s1345_s1 + $0x38] sm:$0xff]  }
  0x3a   :  { %997 = vmatmul.mubr.bf16.gmra.mxu0 %v1050_v40 }
  0x3c   :  { %1013 = vmatpush3.bf16.msra.mxu0 %v1083_v48 }
  0x3d   :  { %636 = vmatmul.mubr.bf16.gmra.mxu1 %v1074_v43  ;;  %1014 = vmatprep.subr.bf16.mxu0 %v1084_v49 }
  0x3e   :  { %643 = vmatprep.mubr.bf16.mxu1 %v1077_v44  ;;  %v1319_v44 = vld [vmem:[%s1348_s4] ss:$0 sm:$0xff]  ;;  %s1113_s4 = smov [#allocation2]  }
  0x3f   :  { %s802_s28 = sshll.u32 %s1113_s4, 4  ;;  %s803_s28 = int_to_ptr.vmem [resolvable:$true] %s802_s28 }
  0x40   :  { %1015 = vmatpush3.bf16.msra.mxu0 %v1084_v49  ;;  %s1091_s29 = scalar_lea.vmem %s803_s28, 2048  ;;  %p1096_p1 = scmp.lt.s32.totalorder %s803_s28, %s803_s28 }
  0x41   :  { %p1092_p0 = scmp.ne.s32.totalorder %s803_s28, %s1091_s29  ;;  %p1097_p2 = scmp.lt.s32.totalorder %s1091_s29, %s1091_s29 }
  0x43   :  { %p1098_p3 = por %p1097_p2, %p1096_p1 }
  0x45   :  { %644 = vmatmul.mubr.bf16.gmra.mxu1 %v1078_v45  ;;  %p1099_p4 = pnand %p1098_p3, %p1092_p0 }
  0x46   :  { %651 = vmatprep.mubr.bf16.mxu1 %v1081_v46 }
  0x4d   :  { %652 = vmatmul.mubr.bf16.gmra.mxu1 %v1082_v47 }
  0x4e   :  { %659 = vmatprep.mubr.bf16.mxu1 %v1085_v50 }
  0x55   :  { %660 = vmatmul.mubr.bf16.gmra.mxu1 %v1086_v51 }
  0x56   :  { %667 = vmatprep.mubr.bf16.mxu1 %v1087_v52 }
  0x5d   :  { %668 = vmatmul.mubr.bf16.gmra.mxu1 %v1088_v53 }
  0x5e   :  { %675 = vmatprep.mubr.bf16.mxu1 %v1089_v54 }
  0x65   :  { %676 = vmatmul.mubr.bf16.gmra.mxu1 %v1090_v55 }
  0xe2   :  { %v986_v56 = vpop.f32.mrf.mxu0 }
  0xe4   :  { %v184_v57 = vpop.f32.mrf.mxu0 }
  0xe5   :  { %v904_v16 = vpop.f32.mrf.mxu1 }
  0xe6   :  { %v987_v58 = vpop.f32.mrf.mxu0 }
  0xe7   :  { %v248_v61 = vpack.c.bf16 %v987_v58, %v986_v56  ;;  %v905_v17 = vpop.f32.mrf.mxu1 }
  0xe8   :  { %v187_v59 = vpop.f32.mrf.mxu0  ;;  %v906_v43 = vadd.f32 %v905_v17, %v904_v16 }
  0xe9   :  { %v247_v60 = vpack.c.bf16 %v187_v59, %v184_v57  ;;  %v907_v18 = vpop.f32.mrf.mxu1 }
  0xea   :  { %v990_v62 = vpop.f32.mrf.mxu0  ;;  %v622_v51 = vadd.f32 %v906_v43, %v1319_v44 }
  0xeb   :  { %1016 = vmatprep.mubr.bf16.mxu0 %v247_v60  ;;  %v908_v19 = vpop.f32.mrf.mxu1 }
  0xec   :  { %v200_v63 = vpop.f32.mrf.mxu0  ;;  %1017 = vmatmul.mubr.bf16.vlgmr.msra.gmra.mxu0 %v248_v61  ;;  %v909_v49 = vadd.f32 %v908_v19, %v907_v18 }
  0xee   :  { %v991_v0 = vpop.f32.mrf.mxu0  ;;  %v625_v60 = vadd.f32 %v909_v49, %v1319_v44 }
  0xef   :  { %v250_v3 = vpack.c.bf16 %v991_v0, %v990_v62 }
  0xf0   :  { %v203_v1 = vpop.f32.mrf.mxu0 }
  0xf1   :  { %v249_v2 = vpack.c.bf16 %v203_v1, %v200_v63 }
  0xf2   :  { %v994_v4 = vpop.f32.mrf.mxu0 }
  0xf3   :  { %1020 = vmatprep.mubr.bf16.mxu0 %v249_v2 }
  0xf4   :  { %v216_v5 = vpop.f32.mrf.mxu0  ;;  %1021 = vmatmul.mubr.bf16.gmra.mxu0 %v250_v3 }
  0xf5   :  { %v910_v20 = vpop.f32.mrf.mxu1 }
  0xf6   :  { %v995_v6 = vpop.f32.mrf.mxu0 }
  0xf7   :  { %v252_v9 = vpack.c.bf16 %v995_v6, %v994_v4  ;;  %v911_v21 = vpop.f32.mrf.mxu1 }
  0xf8   :  { %v219_v7 = vpop.f32.mrf.mxu0  ;;  %v912_v41 = vadd.f32 %v911_v21, %v910_v20 }
  0xf9   :  { %v251_v8 = vpack.c.bf16 %v219_v7, %v216_v5  ;;  %v913_v22 = vpop.f32.mrf.mxu1 }
  0xfa   :  { %v998_v10 = vpop.f32.mrf.mxu0  ;;  %v630_v46 = vadd.f32 %v912_v41, %v1319_v44 }
  0xfb   :  { %1024 = vmatprep.mubr.bf16.mxu0 %v251_v8  ;;  %v914_v23 = vpop.f32.mrf.mxu1 }
  0xfc   :  { %v232_v11 = vpop.f32.mrf.mxu0  ;;  %1025 = vmatmul.mubr.bf16.gmra.mxu0 %v252_v9  ;;  %v915_v45 = vadd.f32 %v914_v23, %v913_v22 }
  0xfd   :  { %v916_v24 = vpop.f32.mrf.mxu1 }
  0xfe   :  { %v999_v12 = vpop.f32.mrf.mxu0  ;;  %v633_v55 = vadd.f32 %v915_v45, %v1319_v44 }
  0xff   :  { %v254_v15 = vpack.c.bf16 %v999_v12, %v998_v10  ;;  %v917_v25 = vpop.f32.mrf.mxu1 }
 0x100   :  { %v235_v13 = vpop.f32.mrf.mxu0  ;;  %v918_v58 = vadd.f32 %v917_v25, %v916_v24 }
 0x101   :  { %v253_v14 = vpack.c.bf16 %v235_v13, %v232_v11  ;;  %v919_v26 = vpop.f32.mrf.mxu1 }
 0x102   :  { %v638_v5 = vadd.f32 %v918_v58, %v1319_v44 }
 0x103   :  { %1028 = vmatprep.mubr.bf16.mxu0 %v253_v14  ;;  %v920_v27 = vpop.f32.mrf.mxu1 }
 0x104   :  { %1029 = vmatmul.mubr.bf16.gmra.mxu0 %v254_v15  ;;  %v921_v3 = vadd.f32 %v920_v27, %v919_v26 }
 0x105   :  { %v922_v28 = vpop.f32.mrf.mxu1 }
 0x106   :  { %v641_v14 = vadd.f32 %v921_v3, %v1319_v44 }
 0x107   :  { %v923_v29 = vpop.f32.mrf.mxu1 }
 0x108   :  { %v924_v53 = vadd.f32 %v923_v29, %v922_v28 }
 0x109   :  { %v925_v30 = vpop.f32.mrf.mxu1 }
 0x10a   :  { %v646_v0 = vadd.f32 %v924_v53, %v1319_v44 }
 0x10b   :  { %v926_v31 = vpop.f32.mrf.mxu1 }
 0x10c   :  { %v927_v62 = vadd.f32 %v926_v31, %v925_v30 }
 0x10d   :  { %v928_v32 = vpop.f32.mrf.mxu1 }
 0x10e   :  { %v649_v9 = vadd.f32 %v927_v62, %v1319_v44 }
 0x10f   :  { %v929_v33 = vpop.f32.mrf.mxu1 }
 0x110   :  { %v930_v12 = vadd.f32 %v929_v33, %v928_v32 }
 0x111   :  { %v931_v34 = vpop.f32.mrf.mxu1 }
 0x112   :  { %v654_v24 = vadd.f32 %v930_v12, %v1319_v44 }
 0x113   :  { %v932_v35 = vpop.f32.mrf.mxu1 }
 0x114   :  { %v933_v21 = vadd.f32 %v932_v35, %v931_v34 }
 0x115   :  { %v934_v36 = vpop.f32.mrf.mxu1 }
 0x116   :  { %v657_v32 = vadd.f32 %v933_v21, %v1319_v44 }
 0x117   :  { %v935_v37 = vpop.f32.mrf.mxu1 }
 0x118   :  { %v936_v7 = vadd.f32 %v935_v37, %v934_v36 }
 0x119   :  { %v937_v38 = vpop.f32.mrf.mxu1 }
 0x11a   :  { %v662_v18 = vadd.f32 %v936_v7, %v1319_v44 }
 0x11b   :  { %v938_v39 = vpop.f32.mrf.mxu1 }
 0x11c   :  { %v939_v16 = vadd.f32 %v938_v39, %v937_v38 }
 0x11d   :  { %v1314_v40 = vpop.f32.mrf.mxu1 }
 0x11e   :  { %v665_v27 = vadd.f32 %v939_v16, %v1319_v44 }
 0x11f   :  { %v941_v42 = vpop.f32.mrf.mxu1 }
 0x120   :  { %v942_v30 = vadd.f32 %v941_v42, %v1314_v40 }
 0x121   :  { %v1322_v48 = vpop.f32.mrf.mxu1 }
 0x122   :  { %v670_v41 = vadd.f32 %v942_v30, %v1319_v44 }
 0x123   :  { %v944_v57 = vpop.f32.mrf.mxu1 }
 0x124   :  { %v945_v38 = vadd.f32 %v944_v57, %v1322_v48 }
 0x125   :  { %v946_v2 = vpop.f32.mrf.mxu1 }
 0x127   :  { %v947_v11 = vpop.f32.mrf.mxu1 }
 0x128   :  { %v948_v22 = vadd.f32 %v947_v11, %v946_v2 }
 0x129   :  { %v949_v20 = vpop.f32.mrf.mxu1 }
 0x12a   :  { %v678_v33 = vadd.f32 %v948_v22, %v1319_v44 }
 0x12b   :  { %v950_v28 = vpop.f32.mrf.mxu1 }
 0x12c   :  { %v951_v35 = vadd.f32 %v950_v28, %v949_v20 }
 0x12e   :  { %v681_v42 = vadd.f32 %v951_v35, %v1319_v44 }
 0x1ac   :  { %v1018_v47 = vpop.f32.mrf.mxu0 }
 0x1ad   :  { %v727_v50 = vadd.f32 %v1018_v47, %v630_v46  ;;  %v673_v47 = vadd.f32 %v945_v38, %v1319_v44 }
 0x1ae   :  { %v718_v52 = vpop.f32.mrf.mxu0 }
 0x1af   :  { %783 = vst [vmem:[#allocation2 + $0x10] sm:$0xff] %v727_v50  ;;  %v719_v54 = vadd.f32 %v718_v52, %v622_v51 }
 0x1b0   :  { %v1019_v56 = vpop.f32.mrf.mxu0 }
 0x1b1   :  { %781 = vst [vmem:[#allocation2] sm:$0xff] %v719_v54  ;;  %v730_v59 = vadd.f32 %v1019_v56, %v633_v55 }
 0x1b2   :  { %v721_v61 = vpop.f32.mrf.mxu0 }
 0x1b3   :  { %784 = vst [vmem:[#allocation2 + $0x18] sm:$0xff] %v730_v59  ;;  %v722_v63 = vadd.f32 %v721_v61, %v625_v60 }
 0x1b4   :  { %v1022_v1 = vpop.f32.mrf.mxu0 }
 0x1b5   :  { %782 = vst [vmem:[#allocation2 + $0x8] sm:$0xff] %v722_v63  ;;  %v743_v4 = vadd.f32 %v1022_v1, %v646_v0 }
 0x1b6   :  { %v734_v6 = vpop.f32.mrf.mxu0 }
 0x1b7   :  { %787 = vst [vmem:[#allocation2 + $0x30] sm:$0xff] %v743_v4  ;;  %v735_v8 = vadd.f32 %v734_v6, %v638_v5 }
 0x1b8   :  { %v1023_v10 = vpop.f32.mrf.mxu0 }
 0x1b9   :  { %785 = vst [vmem:[#allocation2 + $0x20] sm:$0xff] %v735_v8  ;;  %v746_v13 = vadd.f32 %v1023_v10, %v649_v9 }
 0x1ba   :  { %v737_v15 = vpop.f32.mrf.mxu0 }
 0x1bb   :  { %788 = vst [vmem:[#allocation2 + $0x38] sm:$0xff] %v746_v13  ;;  %v738_v17 = vadd.f32 %v737_v15, %v641_v14 }
 0x1bc   :  { %v1026_v19 = vpop.f32.mrf.mxu0 }
 0x1bd   :  { %786 = vst [vmem:[#allocation2 + $0x28] sm:$0xff] %v738_v17  ;;  %v759_v23 = vadd.f32 %v1026_v19, %v662_v18 }
 0x1be   :  { %v750_v25 = vpop.f32.mrf.mxu0 }
 0x1bf   :  { %791 = vst [vmem:[#allocation2 + $0x50] sm:$0xff] %v759_v23  ;;  %v751_v26 = vadd.f32 %v750_v25, %v654_v24 }
 0x1c0   :  { %v1027_v29 = vpop.f32.mrf.mxu0 }
 0x1c1   :  { %789 = vst [vmem:[#allocation2 + $0x40] sm:$0xff] %v751_v26  ;;  %v762_v31 = vadd.f32 %v1027_v29, %v665_v27 }
 0x1c2   :  { %v753_v34 = vpop.f32.mrf.mxu0 }
 0x1c3   :  { %792 = vst [vmem:[#allocation2 + $0x58] sm:$0xff] %v762_v31  ;;  %v754_v36 = vadd.f32 %v753_v34, %v657_v32 }
 0x1c4   :  { %v1030_v37 = vpop.f32.mrf.mxu0 }
 0x1c5   :  { %790 = vst [vmem:[#allocation2 + $0x48] sm:$0xff] %v754_v36  ;;  %v775_v39 = vadd.f32 %v1030_v37, %v678_v33 }
 0x1c6   :  { %v766_v43 = vpop.f32.mrf.mxu0 }
 0x1c7   :  { %795 = vst [vmem:[#allocation2 + $0x70] sm:$0xff] %v775_v39  ;;  %v767_v40 = vadd.f32 %v766_v43, %v670_v41 }
 0x1c8   :  { %v1031_v45 = vpop.f32.mrf.mxu0 }
 0x1c9   :  { %793 = vst [vmem:[#allocation2 + $0x60] sm:$0xff] %v767_v40  ;;  %v778_v46 = vadd.f32 %v1031_v45, %v681_v42 }
 0x1ca   :  { %v769_v49 = vpop.f32.mrf.mxu0 }
 0x1cb   :  { %796 = vst [vmem:[#allocation2 + $0x78] sm:$0xff] %v778_v46  ;;  %v770_v48 = vadd.f32 %v769_v49, %v673_v47 }
 0x1cd   :  { %794 = vst [vmem:[#allocation2 + $0x68] sm:$0xff] %v770_v48 }
 0x1ce   :  { %1102 = shalt.err (!%p1099_p4)
}
 0x1cf   :  { %s1114_s30 = smov 128   ;;  %s1115_s6 = smov 8  }
 0x1d0   :  { %808 = dma.vmem_to_hbm [thread:$0]  %s803_s28, 2048, %s1349_s5, [#allocation3], %s1114_s30, %s1114_s30, %s1115_s6  }
 0x1d1   :  { %1111 = dma.done.wait [#allocation3], 2048  }
 0x1d2   :  { %1112 = vsyncadd [#allocation3], 4294965248 }
 0x1d3   :  { %812 = vsyncpa [#allocation3], 1 }

</bundles_post_ra>
